<compile_context>
chip_gen: v6e
topology: v6e:2x2x1
jax: 0.10.0
libtpu: 0.0.40
codegen_flags: <defaults>
</compile_context>

<pallas_src>
import functools
import math

import jax
import jax.numpy as jnp
import numpy as np
from jax.experimental import pallas as pl
from jax.experimental.pallas import tpu as pltpu

# ----- constants from the PyTorch file ---------------------------------------
RADIUS = 8
DIAMETER = RADIUS * 2 + 1                      # 17
VOLUME = DIAMETER * (DIAMETER * 2 - 1)         # 561
# size0/size1/size2 are undefined globals in the PyTorch snippet; pick small values.
SIZE0, SIZE1, SIZE2 = 3, 5, 7

_EPS = 1e-5
_NEG = -1e9
HEADS_PAD = 128                                # lane-dense fused head output width
_VMEM_LIMIT = 64 * 1024 * 1024                 # raise scoped VMEM (v5e default 16 MiB)


# ----- small helpers ----------------------------------------------------------
def _round_up(a, b):
    return (a + b - 1) // b * b


def _ln(x, g, b):
    mu = jnp.mean(x, axis=-1, keepdims=True)
    var = jnp.mean(jnp.square(x - mu), axis=-1, keepdims=True)
    return (x - mu) * jax.lax.rsqrt(var + _EPS) * g + b


def _cparams(semantics):
    return pltpu.CompilerParams(dimension_semantics=semantics,
                                vmem_limit_bytes=_VMEM_LIMIT)


def _pick_batch_tile(B, L, W, nhead, ndense, budget_bytes=28 * 1024 * 1024):
    """Largest divisor of B that (a) keeps >=2 batch tiles when B >= 2 (so the
    'parallel' axis can shard across v7x's two TensorCores) and (b) fits the
    resident activation + attention intermediates + streamed weights in VMEM."""
    ceiling = max(1, B // 2) if B >= 2 else 1
    best = 1
    for tb in range(1, ceiling + 1):
        if B % tb:
            continue
        act = tb * L * W * 4                          # resident f32 activation (out block)
        mem_in = 2 * tb * L * W * 2                   # double-buffered bf16 embed input
        qkv = tb * L * 3 * W * 4                      # fused QKV intermediate
        scores = 2 * tb * nhead * L * L * 4           # scores + probs
        ffi = tb * L * ndense * 4                     # FFN intermediate
        wbytes = 2 * (4 * W * W + 2 * W * ndense) * 2  # double-buffered bf16 layer weights
        if act + mem_in + qkv + scores + ffi + wbytes + (2 << 20) <= budget_bytes:
            best = tb
    return best


# ----- kernel 1: DistBlock + embed MLP (row-tiled) ----------------------------
def embed_kernel(x_ref, w1a_ref, w1b_ref, w1c_ref, b1_ref, g1_ref, be1_ref,
                 w2_ref, b2_ref, g2_ref, be2_ref, out_ref):
    x1 = x_ref[...] * (1.0 / 3.8)                # (TM, VOLUME) f32
    x2 = x1 * x1
    x3 = x2 * x1
    # divides -> EUP approx reciprocal (frees VALU slots)
    f1 = pl.reciprocal(1.0 + x1, approx=True).astype(jnp.bfloat16)
    f2 = pl.reciprocal(1.0 + x2, approx=True).astype(jnp.bfloat16)
    f3 = pl.reciprocal(1.0 + x3, approx=True).astype(jnp.bfloat16)
    # cat([f1,f2,f3], -1) @ W1  ==  f1@W1a + f2@W1b + f3@W1c  (W1 split on K rows)
    h = (jnp.dot(f1, w1a_ref[...], preferred_element_type=jnp.float32)
         + jnp.dot(f2, w1b_ref[...], preferred_element_type=jnp.float32)
         + jnp.dot(f3, w1c_ref[...], preferred_element_type=jnp.float32)
         + b1_ref[...])
    h = jnp.maximum(_ln(h, g1_ref[...], be1_ref[...]), 0.0)
    h = jnp.dot(h.astype(jnp.bfloat16), w2_ref[...],
                preferred_element_type=jnp.float32) + b2_ref[...]
    out_ref[...] = jnp.maximum(_ln(h, g2_ref[...], be2_ref[...]),
                               0.0).astype(out_ref.dtype)


# ----- kernel 2: fused post-norm TransformerEncoder stack ---------------------
# grid = (batch tiles [parallel], depth [arbitrary]); activation lives in the
# output VMEM block across the depth axis while per-layer weights stream in.
def encoder_stack_kernel(kbias_ref, mem_ref,
                         wqkv_ref, bqkv_ref, wo_ref, bo_ref, g1_ref, be1_ref,
                         wf1_ref, bf1_ref, wf2_ref, bf2_ref, g2_ref, be2_ref,
                         out_ref, *, nhead):
    d = pl.program_id(1)

    @pl.when(d == 0)
    def _():
        # bf16 embed output is fetched once per batch tile (constant index map)
        out_ref[...] = mem_ref[...].astype(jnp.float32)

    x = out_ref[...]                             # (TB, L, W) f32, resident across depth
    TB, L, W = x.shape
    dh = W // nhead
    scale = 1.0 / math.sqrt(dh)

    x2 = x.reshape(TB * L, W)
    # fused Q/K/V projection: one (W, 3W) matmul
    qkv = (jnp.dot(x2.astype(jnp.bfloat16), wqkv_ref[...],
                   preferred_element_type=jnp.float32) + bqkv_ref[...])

    if nhead == 1:
        # no head relayout needed at all
        q = (qkv[:, :W] * scale).reshape(TB, L, dh)      # scale folded into q
        k = qkv[:, W:2 * W].reshape(TB, L, dh)
        v = qkv[:, 2 * W:].reshape(TB, L, dh)
        nb = TB
        key_bias = kbias_ref[...]                        # (TB, 1, L)
    else:
        # single relayout: (TB, L, 3*nhead, dh) -> (TB, 3*nhead, L, dh)
        qkv4 = jnp.swapaxes(qkv.reshape(TB, L, 3 * nhead, dh), 1, 2)
        q = (qkv4[:, :nhead] * scale).reshape(TB * nhead, L, dh)
        k = qkv4[:, nhead:2 * nhead].reshape(TB * nhead, L, dh)
        v = qkv4[:, 2 * nhead:].reshape(TB * nhead, L, dh)
        nb = TB * nhead
        key_bias = jnp.broadcast_to(kbias_ref[...], (TB, nhead, L)).reshape(nb, 1, L)

    scores = jnp.einsum('bqd,bkd->bqk',
                        q.astype(jnp.bfloat16), k.astype(jnp.bfloat16),
                        preferred_element_type=jnp.float32) + key_bias
    m = jnp.max(scores, axis=-1, keepdims=True)
    ex = jnp.exp(scores - m)
    p = ex * pl.reciprocal(jnp.sum(ex, axis=-1, keepdims=True), approx=True)
    ctx = jnp.einsum('bqk,bkd->bqd',
                     p.astype(jnp.bfloat16), v.astype(jnp.bfloat16),
                     preferred_element_type=jnp.float32)         # (nb, L, dh)

    if nhead == 1:
        ctx2 = ctx.reshape(TB * L, W)
    else:
        ctx2 = jnp.swapaxes(ctx.reshape(TB, nhead, L, dh), 1, 2).reshape(TB * L, W)

    attn = (jnp.dot(ctx2.astype(jnp.bfloat16), wo_ref[...],
                    preferred_element_type=jnp.float32) + bo_ref[...])
    h1 = _ln(x2 + attn, g1_ref[...], be1_ref[...])               # norm1(residual)
    ff = jnp.maximum(jnp.dot(h1.astype(jnp.bfloat16), wf1_ref[...],
                             preferred_element_type=jnp.float32) + bf1_ref[...], 0.0)
    ff = (jnp.dot(ff.astype(jnp.bfloat16), wf2_ref[...],
                  preferred_element_type=jnp.float32) + bf2_ref[...])
    h2 = _ln(h1 + ff, g2_ref[...], be2_ref[...])                 # norm2(residual)
    out_ref[...] = h2.reshape(TB, L, W)


# ----- kernel 3: masked mean pool + concat(emd) + fused multitask heads -------
def pool_heads_kernel(mem_ref, maskp_ref, emd_ref, wh_ref, bh_ref,
                      memcat_ref, heads_ref):
    mem = mem_ref[...]                           # (TBp, L, W) f32
    keep = 1.0 - maskp_ref[...]                  # (TBp, L, 1); maskp 1.0 = padded
    summed = jnp.sum(mem * keep, axis=1)         # (TBp, W)
    denom = jnp.sum(keep, axis=1)                # (TBp, 1) == L - sum(mask)
    pooled = summed / jnp.maximum(denom, 1.0)    # clamp guards fully-padded rows
    emd = emd_ref[...].reshape(pooled.shape[0], -1)
    memcat = jnp.concatenate([pooled, emd], axis=1)              # (TBp, W + E)
    memcat_ref[...] = memcat.reshape(memcat_ref.shape)
    # fused out0|out1|out2, lane-padded to HEADS_PAD -> one lane-dense store
    heads = (jnp.dot(memcat.astype(jnp.bfloat16), wh_ref[...],
                     preferred_element_type=jnp.float32) + bh_ref[...])
    heads_ref[...] = heads.reshape(heads_ref.shape)


# ----- parameter construction (deterministic, PyTorch-style uniform init) -----
def _linear(key, fan_in, fan_out):
    kw, kb = jax.random.split(key)
    bound = 1.0 / np.sqrt(fan_in)
    w = jax.random.uniform(kw, (fan_in, fan_out), jnp.float32, -bound, bound)
    b = jax.random.uniform(kb, (1, fan_out), jnp.float32, -bound, bound)
    return w, b


def init_esmc_params(key, depth, width, emd_length):
    assert width % 64 == 0
    nhead, ndense = width // 64, width * 4
    keys = jax.random.split(key, 8 + depth)
    p = {"width": width, "nhead": nhead, "ndense": ndense, "depth": depth,
         "emd_length": emd_length}
    bf = jnp.bfloat16

    # embed: Linear(V*3, ndense) -> LN -> ReLU -> Linear(ndense, width) -> LN -> ReLU
    w1, b1 = _linear(keys[0], VOLUME * 3, ndense)
    w2, b2 = _linear(keys[1], ndense, width)
    p["embed"] = dict(
        w1a=w1[:VOLUME].astype(bf),
        w1b=w1[VOLUME:2 * VOLUME].astype(bf),
        w1c=w1[2 * VOLUME:].astype(bf),
        b1=b1,
        g1=jnp.ones((1, ndense), jnp.float32), be1=jnp.zeros((1, ndense), jnp.float32),
        w2=w2.astype(bf), b2=b2,
        g2=jnp.ones((1, width), jnp.float32), be2=jnp.zeros((1, width), jnp.float32))

    # encoder layers, stacked along a leading depth axis (streamed per grid step)
    acc = {k: [] for k in ("wqkv", "bqkv", "wo", "bo", "g1", "be1",
                           "wf1", "bf1", "wf2", "bf2", "g2", "be2")}
    for d in range(depth):
        lk = jax.random.split(keys[2 + d], 8)
        wq, bq = _linear(lk[0], width, width)
        wk, bk = _linear(lk[1], width, width)
        wv, bv = _linear(lk[2], width, width)
        wo, bo = _linear(lk[3], width, width)
        wf1, bf1 = _linear(lk[4], width, ndense)
        wf2, bf2 = _linear(lk[5], ndense, width)
        acc["wqkv"].append(jnp.concatenate([wq, wk, wv], axis=1).astype(bf))
        acc["bqkv"].append(jnp.concatenate([bq, bk, bv], axis=1))
        acc["wo"].append(wo.astype(bf)); acc["bo"].append(bo)
        acc["g1"].append(jnp.ones((1, width), jnp.float32))
        acc["be1"].append(jnp.zeros((1, width), jnp.float32))
        acc["wf1"].append(wf1.astype(bf)); acc["bf1"].append(bf1)
        acc["wf2"].append(wf2.astype(bf)); acc["bf2"].append(bf2)
        acc["g2"].append(jnp.ones((1, width), jnp.float32))
        acc["be2"].append(jnp.zeros((1, width), jnp.float32))
    p["enc"] = {k: jnp.stack(v) for k, v in acc.items()}

    # BaseNet heads on width + emd_length, fused and lane padded to HEADS_PAD
    cat_w = width + emd_length
    w0, b0 = _linear(keys[2 + depth], cat_w, SIZE0)
    wh1, bh1 = _linear(keys[3 + depth], cat_w, SIZE1)
    wh2, bh2 = _linear(keys[4 + depth], cat_w, SIZE2)
    nout = SIZE0 + SIZE1 + SIZE2
    wh = jnp.pad(jnp.concatenate([w0, wh1, wh2], axis=1),
                 ((0, 0), (0, HEADS_PAD - nout))).astype(bf)
    bh = jnp.pad(jnp.concatenate([b0, bh1, bh2], axis=1),
                 ((0, 0), (0, HEADS_PAD - nout)))
    p["heads"] = dict(wh=wh, bh=bh)
    return p


# ----- forward ----------------------------------------------------------------
def esmc_forward(params, x, mask, emd):
    B, L, V = x.shape
    assert V == VOLUME
    W = params["width"]
    nhead = params["nhead"]
    ndense = params["ndense"]
    depth = params["depth"]
    E = params["emd_length"]

    # ---- embed (DistBlock + MLP), tiled over token rows, bf16 output ---------
    N = B * L
    TM = 512 if N >= 512 else _round_up(N, 8)
    N_pad = _round_up(N, TM)
    x_flat = x.reshape(N, V).astype(jnp.float32)
    if N_pad != N:
        x_flat = jnp.pad(x_flat, ((0, N_pad - N), (0, 0)))   # row pad only; no feature pad
    e = params["embed"]
    weight_args = (e["w1a"], e["w1b"], e["w1c"], e["b1"], e["g1"], e["be1"],
                   e["w2"], e["b2"], e["g2"], e["be2"])
    h = pl.pallas_call(
        embed_kernel,
        grid=(N_pad // TM,),
        in_specs=[pl.BlockSpec((TM, V), lambda i: (i, 0))]
                 + [pl.BlockSpec(a.shape, lambda i: (0, 0),
                                 pipeline_mode=pl.Buffered(1))   # grid-invariant weights
                    for a in weight_args],
        out_specs=pl.BlockSpec((TM, W), lambda i: (i, 0)),
        out_shape=jax.ShapeDtypeStruct((N_pad, W), jnp.bfloat16),
        compiler_params=_cparams(("parallel",)),
    )(x_flat, *weight_args)
    mem = h[:N].reshape(B, L, W)                 # bf16

    # ---- fused transformer encoder stack -------------------------------------
    maskf = mask.astype(jnp.float32)             # (B, L); 1.0 = padded key
    key_bias = (maskf * _NEG).reshape(B, 1, L)   # precomputed additive key bias
    enc = params["enc"]
    TB = _pick_batch_tile(B, L, W, nhead, ndense)

    def bmap(b, d):
        return (b, 0, 0)

    def dmap(b, d):
        return (d, 0, 0)

    w_keys = ("wqkv", "bqkv", "wo", "bo", "g1", "be1",
              "wf1", "bf1", "wf2", "bf2", "g2", "be2")
    w_specs = [pl.BlockSpec((None,) + enc[k].shape[1:], dmap) for k in w_keys]

    mem = pl.pallas_call(
        functools.partial(encoder_stack_kernel, nhead=nhead),
        grid=(B // TB, depth),
        in_specs=[pl.BlockSpec((TB, 1, L), bmap),          # additive key bias
                  pl.BlockSpec((TB, L, W), bmap)] + w_specs,
        out_specs=pl.BlockSpec((TB, L, W), bmap),
        out_shape=jax.ShapeDtypeStruct((B, L, W), jnp.float32),
        compiler_params=_cparams(("parallel", "arbitrary")),
    )(key_bias, mem, *[enc[k] for k in w_keys])

    # ---- masked mean pool + concat(emd) + fused multitask heads (batch-tiled) -
    hd = params["heads"]
    maskp = maskf.reshape(B, L, 1)
    emd3 = emd.astype(jnp.float32).reshape(B, 1, E)
    TBp = TB
    memcat3, heads3 = pl.pallas_call(
        pool_heads_kernel,
        grid=(B // TBp,),
        in_specs=[pl.BlockSpec((TBp, L, W), lambda b: (b, 0, 0)),
                  pl.BlockSpec((TBp, L, 1), lambda b: (b, 0, 0)),
                  pl.BlockSpec((TBp, 1, E), lambda b: (b, 0, 0)),
                  pl.BlockSpec(hd["wh"].shape, lambda b: (0, 0)),
                  pl.BlockSpec(hd["bh"].shape, lambda b: (0, 0))],
        out_specs=(pl.BlockSpec((TBp, 1, W + E), lambda b: (b, 0, 0)),
                   pl.BlockSpec((TBp, 1, HEADS_PAD), lambda b: (b, 0, 0))),
        out_shape=(jax.ShapeDtypeStruct((B, 1, W + E), jnp.float32),
                   jax.ShapeDtypeStruct((B, 1, HEADS_PAD), jnp.float32)),
        compiler_params=_cparams(("parallel",)),
    )(mem, maskp, emd3, hd["wh"], hd["bh"])

    memcat = memcat3.reshape(B, W + E)
    heads = heads3.reshape(B, HEADS_PAD)
    o0 = heads[:, :SIZE0]
    o1 = heads[:, SIZE0:SIZE0 + SIZE1]
    o2 = heads[:, SIZE0 + SIZE1:SIZE0 + SIZE1 + SIZE2]
    return o0, o1, o2, memcat


# ----- main -------------------------------------------------------------------
if __name__ == "__main__":
    depth, width, emd_length = 2, 64, 16
    B, L = 2, 8

    key = jax.random.PRNGKey(0)
    kp, kx, km, ke = jax.random.split(key, 4)

    params = init_esmc_params(kp, depth, width, emd_length)

    x = jax.random.uniform(kx, (B, L, VOLUME), jnp.float32, 0.0, 10.0)
    mask = jax.random.bernoulli(km, 0.3, (B, L))
    mask = mask.at[:, 0].set(False)              # keep at least one valid token per row
    emd = jax.random.normal(ke, (B, emd_length), jnp.float32)

    o0, o1, o2, mem_cat = esmc_forward(params, x, mask, emd)
    jax.block_until_ready((o0, o1, o2, mem_cat))

    assert o0.shape == (B, SIZE0) and o1.shape == (B, SIZE1)
    assert o2.shape == (B, SIZE2) and mem_cat.shape == (B, width + emd_length)
    assert bool(jnp.all(jnp.isfinite(o0)) & jnp.all(jnp.isfinite(o1))
                & jnp.all(jnp.isfinite(o2)) & jnp.all(jnp.isfinite(mem_cat)))
    print("KERNEL_OK")
</pallas_src>

<mosaic_0001>
module attributes {stable_mosaic.version = 11 : i64} {
  func.func @embed_kernel(%arg0: i32, %arg1: memref<16x561xf32, #tpu.memory_space<vmem>>, %arg2: memref<561x256xbf16, #tpu.memory_space<vmem>>, %arg3: memref<561x256xbf16, #tpu.memory_space<vmem>>, %arg4: memref<561x256xbf16, #tpu.memory_space<vmem>>, %arg5: memref<1x256xf32, #tpu.memory_space<vmem>>, %arg6: memref<1x256xf32, #tpu.memory_space<vmem>>, %arg7: memref<1x256xf32, #tpu.memory_space<vmem>>, %arg8: memref<256x64xbf16, #tpu.memory_space<vmem>>, %arg9: memref<1x64xf32, #tpu.memory_space<vmem>>, %arg10: memref<1x64xf32, #tpu.memory_space<vmem>>, %arg11: memref<1x64xf32, #tpu.memory_space<vmem>>, %arg12: memref<16x64xbf16, #tpu.memory_space<vmem>>) attributes {dimension_semantics = [#tpu.dimension_semantics<parallel>], iteration_bounds = array<i64: 1>, scalar_prefetch = 0 : i64, scratch_operands = 0 : i64, tpu.core_type = #tpu.core_type<tc>, window_params = [{transform_indices = @transform_0, window_bounds = array<i64: 16, 561>}, {pipeline_mode = #tpu.pipeline_mode<synchronous>, transform_indices = @transform_1, window_bounds = array<i64: 561, 256>}, {pipeline_mode = #tpu.pipeline_mode<synchronous>, transform_indices = @transform_2, window_bounds = array<i64: 561, 256>}, {pipeline_mode = #tpu.pipeline_mode<synchronous>, transform_indices = @transform_3, window_bounds = array<i64: 561, 256>}, {pipeline_mode = #tpu.pipeline_mode<synchronous>, transform_indices = @transform_4, window_bounds = array<i64: 1, 256>}, {pipeline_mode = #tpu.pipeline_mode<synchronous>, transform_indices = @transform_5, window_bounds = array<i64: 1, 256>}, {pipeline_mode = #tpu.pipeline_mode<synchronous>, transform_indices = @transform_6, window_bounds = array<i64: 1, 256>}, {pipeline_mode = #tpu.pipeline_mode<synchronous>, transform_indices = @transform_7, window_bounds = array<i64: 256, 64>}, {pipeline_mode = #tpu.pipeline_mode<synchronous>, transform_indices = @transform_8, window_bounds = array<i64: 1, 64>}, {pipeline_mode = #tpu.pipeline_mode<synchronous>, transform_indices = @transform_9, window_bounds = array<i64: 1, 64>}, {pipeline_mode = #tpu.pipeline_mode<synchronous>, transform_indices = @transform_10, window_bounds = array<i64: 1, 64>}, {transform_indices = @transform_11, window_bounds = array<i64: 16, 64>}]} {
    %c0 = arith.constant 0 : index
    %c0_0 = arith.constant 0 : index
    %0 = vector.load %arg1[%c0, %c0_0] : memref<16x561xf32, #tpu.memory_space<vmem>>, vector<16x561xf32>
    %cst = arith.constant 0.263157904 : f32
    %1 = vector.broadcast %cst : f32 to vector<16x561xf32>
    %2 = arith.mulf %0, %1 : vector<16x561xf32>
    %3 = arith.mulf %2, %2 : vector<16x561xf32>
    %4 = arith.mulf %3, %2 : vector<16x561xf32>
    %cst_1 = arith.constant 1.000000e+00 : f32
    %5 = vector.broadcast %cst_1 : f32 to vector<16x561xf32>
    %6 = arith.addf %5, %2 : vector<16x561xf32>
    %7 = tpu.reciprocal %6 {approx = true} : vector<16x561xf32> -> vector<16x561xf32>
    %8 = arith.truncf %7 : vector<16x561xf32> to vector<16x561xbf16>
    %cst_2 = arith.constant 1.000000e+00 : f32
    %9 = vector.broadcast %cst_2 : f32 to vector<16x561xf32>
    %10 = arith.addf %9, %3 : vector<16x561xf32>
    %11 = tpu.reciprocal %10 {approx = true} : vector<16x561xf32> -> vector<16x561xf32>
    %12 = arith.truncf %11 : vector<16x561xf32> to vector<16x561xbf16>
    %cst_3 = arith.constant 1.000000e+00 : f32
    %13 = vector.broadcast %cst_3 : f32 to vector<16x561xf32>
    %14 = arith.addf %13, %4 : vector<16x561xf32>
    %15 = tpu.reciprocal %14 {approx = true} : vector<16x561xf32> -> vector<16x561xf32>
    %16 = arith.truncf %15 : vector<16x561xf32> to vector<16x561xbf16>
    %c0_4 = arith.constant 0 : index
    %c0_5 = arith.constant 0 : index
    %17 = vector.load %arg2[%c0_4, %c0_5] : memref<561x256xbf16, #tpu.memory_space<vmem>>, vector<561x256xbf16>
    %cst_6 = arith.constant dense<0.000000e+00> : vector<16x256xf32>
    %18 = tpu.matmul %8, %17, %cst_6 {dimension_numbers = #tpu.dot_dimension_numbers<[1], [0], [0], [1], [0, 0, 1, 1], [], []>} : vector<16x561xbf16>, vector<561x256xbf16>, vector<16x256xf32> -> vector<16x256xf32>
    %c0_7 = arith.constant 0 : index
    %c0_8 = arith.constant 0 : index
    %19 = vector.load %arg3[%c0_7, %c0_8] : memref<561x256xbf16, #tpu.memory_space<vmem>>, vector<561x256xbf16>
    %cst_9 = arith.constant dense<0.000000e+00> : vector<16x256xf32>
    %20 = tpu.matmul %12, %19, %cst_9 {dimension_numbers = #tpu.dot_dimension_numbers<[1], [0], [0], [1], [0, 0, 1, 1], [], []>} : vector<16x561xbf16>, vector<561x256xbf16>, vector<16x256xf32> -> vector<16x256xf32>
    %21 = arith.addf %18, %20 : vector<16x256xf32>
    %c0_10 = arith.constant 0 : index
    %c0_11 = arith.constant 0 : index
    %22 = vector.load %arg4[%c0_10, %c0_11] : memref<561x256xbf16, #tpu.memory_space<vmem>>, vector<561x256xbf16>
    %cst_12 = arith.constant dense<0.000000e+00> : vector<16x256xf32>
    %23 = tpu.matmul %16, %22, %cst_12 {dimension_numbers = #tpu.dot_dimension_numbers<[1], [0], [0], [1], [0, 0, 1, 1], [], []>} : vector<16x561xbf16>, vector<561x256xbf16>, vector<16x256xf32> -> vector<16x256xf32>
    %24 = arith.addf %21, %23 : vector<16x256xf32>
    %c0_13 = arith.constant 0 : index
    %c0_14 = arith.constant 0 : index
    %25 = vector.load %arg5[%c0_13, %c0_14] : memref<1x256xf32, #tpu.memory_space<vmem>>, vector<1x256xf32>
    %26 = vector.broadcast %25 : vector<1x256xf32> to vector<16x256xf32>
    %27 = arith.addf %24, %26 : vector<16x256xf32>
    %c0_15 = arith.constant 0 : index
    %c0_16 = arith.constant 0 : index
    %28 = vector.load %arg6[%c0_15, %c0_16] : memref<1x256xf32, #tpu.memory_space<vmem>>, vector<1x256xf32>
    %c0_17 = arith.constant 0 : index
    %c0_18 = arith.constant 0 : index
    %29 = vector.load %arg7[%c0_17, %c0_18] : memref<1x256xf32, #tpu.memory_space<vmem>>, vector<1x256xf32>
    %cst_19 = arith.constant dense<0.000000e+00> : vector<16xf32>
    %30 = vector.multi_reduction <add>, %27, %cst_19 [1] : vector<16x256xf32> to vector<16xf32>
    %31 = vector.shape_cast %30 : vector<16xf32> to vector<16x1xf32>
    %cst_20 = arith.constant 2.560000e+02 : f32
    %32 = vector.broadcast %cst_20 : f32 to vector<16x1xf32>
    %33 = arith.divf %31, %32 : vector<16x1xf32>
    %34 = vector.broadcast %33 : vector<16x1xf32> to vector<16x256xf32>
    %35 = arith.subf %27, %34 : vector<16x256xf32>
    %36 = arith.mulf %35, %35 : vector<16x256xf32>
    %cst_21 = arith.constant dense<0.000000e+00> : vector<16xf32>
    %37 = vector.multi_reduction <add>, %36, %cst_21 [1] : vector<16x256xf32> to vector<16xf32>
    %38 = vector.shape_cast %37 : vector<16xf32> to vector<16x1xf32>
    %cst_22 = arith.constant 2.560000e+02 : f32
    %39 = vector.broadcast %cst_22 : f32 to vector<16x1xf32>
    %40 = arith.divf %38, %39 : vector<16x1xf32>
    %41 = vector.broadcast %33 : vector<16x1xf32> to vector<16x256xf32>
    %42 = arith.subf %27, %41 : vector<16x256xf32>
    %cst_23 = arith.constant 9.99999974E-6 : f32
    %43 = vector.broadcast %cst_23 : f32 to vector<16x1xf32>
    %44 = arith.addf %40, %43 : vector<16x1xf32>
    %45 = math.rsqrt %44 : vector<16x1xf32>
    %46 = vector.broadcast %45 : vector<16x1xf32> to vector<16x256xf32>
    %47 = arith.mulf %42, %46 : vector<16x256xf32>
    %48 = vector.broadcast %28 : vector<1x256xf32> to vector<16x256xf32>
    %49 = arith.mulf %47, %48 : vector<16x256xf32>
    %50 = vector.broadcast %29 : vector<1x256xf32> to vector<16x256xf32>
    %51 = arith.addf %49, %50 : vector<16x256xf32>
    %cst_24 = arith.constant 0.000000e+00 : f32
    %52 = vector.broadcast %cst_24 : f32 to vector<16x256xf32>
    %53 = arith.maximumf %51, %52 : vector<16x256xf32>
    %54 = arith.truncf %53 : vector<16x256xf32> to vector<16x256xbf16>
    %c0_25 = arith.constant 0 : index
    %c0_26 = arith.constant 0 : index
    %55 = vector.load %arg8[%c0_25, %c0_26] : memref<256x64xbf16, #tpu.memory_space<vmem>>, vector<256x64xbf16>
    %cst_27 = arith.constant dense<0.000000e+00> : vector<16x64xf32>
    %56 = tpu.matmul %54, %55, %cst_27 {dimension_numbers = #tpu.dot_dimension_numbers<[1], [0], [0], [1], [0, 0, 1, 1], [], []>} : vector<16x256xbf16>, vector<256x64xbf16>, vector<16x64xf32> -> vector<16x64xf32>
    %c0_28 = arith.constant 0 : index
    %c0_29 = arith.constant 0 : index
    %57 = vector.load %arg9[%c0_28, %c0_29] : memref<1x64xf32, #tpu.memory_space<vmem>>, vector<1x64xf32>
    %58 = vector.broadcast %57 : vector<1x64xf32> to vector<16x64xf32>
    %59 = arith.addf %56, %58 : vector<16x64xf32>
    %c0_30 = arith.constant 0 : index
    %c0_31 = arith.constant 0 : index
    %60 = vector.load %arg10[%c0_30, %c0_31] : memref<1x64xf32, #tpu.memory_space<vmem>>, vector<1x64xf32>
    %c0_32 = arith.constant 0 : index
    %c0_33 = arith.constant 0 : index
    %61 = vector.load %arg11[%c0_32, %c0_33] : memref<1x64xf32, #tpu.memory_space<vmem>>, vector<1x64xf32>
    %cst_34 = arith.constant dense<0.000000e+00> : vector<16xf32>
    %62 = vector.multi_reduction <add>, %59, %cst_34 [1] : vector<16x64xf32> to vector<16xf32>
    %63 = vector.shape_cast %62 : vector<16xf32> to vector<16x1xf32>
    %cst_35 = arith.constant 6.400000e+01 : f32
    %64 = vector.broadcast %cst_35 : f32 to vector<16x1xf32>
    %65 = arith.divf %63, %64 : vector<16x1xf32>
    %66 = vector.broadcast %65 : vector<16x1xf32> to vector<16x64xf32>
    %67 = arith.subf %59, %66 : vector<16x64xf32>
    %68 = arith.mulf %67, %67 : vector<16x64xf32>
    %cst_36 = arith.constant dense<0.000000e+00> : vector<16xf32>
    %69 = vector.multi_reduction <add>, %68, %cst_36 [1] : vector<16x64xf32> to vector<16xf32>
    %70 = vector.shape_cast %69 : vector<16xf32> to vector<16x1xf32>
    %cst_37 = arith.constant 6.400000e+01 : f32
    %71 = vector.broadcast %cst_37 : f32 to vector<16x1xf32>
    %72 = arith.divf %70, %71 : vector<16x1xf32>
    %73 = vector.broadcast %65 : vector<16x1xf32> to vector<16x64xf32>
    %74 = arith.subf %59, %73 : vector<16x64xf32>
    %cst_38 = arith.constant 9.99999974E-6 : f32
    %75 = vector.broadcast %cst_38 : f32 to vector<16x1xf32>
    %76 = arith.addf %72, %75 : vector<16x1xf32>
    %77 = math.rsqrt %76 : vector<16x1xf32>
    %78 = vector.broadcast %77 : vector<16x1xf32> to vector<16x64xf32>
    %79 = arith.mulf %74, %78 : vector<16x64xf32>
    %80 = vector.broadcast %60 : vector<1x64xf32> to vector<16x64xf32>
    %81 = arith.mulf %79, %80 : vector<16x64xf32>
    %82 = vector.broadcast %61 : vector<1x64xf32> to vector<16x64xf32>
    %83 = arith.addf %81, %82 : vector<16x64xf32>
    %cst_39 = arith.constant 0.000000e+00 : f32
    %84 = vector.broadcast %cst_39 : f32 to vector<16x64xf32>
    %85 = arith.maximumf %83, %84 : vector<16x64xf32>
    %86 = arith.truncf %85 : vector<16x64xf32> to vector<16x64xbf16>
    %c0_40 = arith.constant 0 : index
    %c0_41 = arith.constant 0 : index
    %87 = vector.load %arg12[%c0_40, %c0_41] : memref<16x64xbf16, #tpu.memory_space<vmem>>, vector<16x64xbf16>
    tpu.vector_store %arg12[%c0_40, %c0_41], %86 {strides = array<i32>} : memref<16x64xbf16, #tpu.memory_space<vmem>>, vector<16x64xbf16>,
    return
  }
  func.func @transform_0(%arg0: i32) -> (i32, i32) {
    %c0_i32 = arith.constant 0 : i32
    %c0_i32_0 = arith.constant 0 : i32
    return %arg0, %c0_i32 : i32, i32
  }
  func.func @transform_1(%arg0: i32) -> (i32, i32) {
    %c0_i32 = arith.constant 0 : i32
    %c0_i32_0 = arith.constant 0 : i32
    %c0_i32_1 = arith.constant 0 : i32
    return %c0_i32, %c0_i32_0 : i32, i32
  }
  func.func @transform_2(%arg0: i32) -> (i32, i32) {
    %c0_i32 = arith.constant 0 : i32
    %c0_i32_0 = arith.constant 0 : i32
    %c0_i32_1 = arith.constant 0 : i32
    return %c0_i32, %c0_i32_0 : i32, i32
  }
  func.func @transform_3(%arg0: i32) -> (i32, i32) {
    %c0_i32 = arith.constant 0 : i32
    %c0_i32_0 = arith.constant 0 : i32
    %c0_i32_1 = arith.constant 0 : i32
    return %c0_i32, %c0_i32_0 : i32, i32
  }
  func.func @transform_4(%arg0: i32) -> (i32, i32) {
    %c0_i32 = arith.constant 0 : i32
    %c0_i32_0 = arith.constant 0 : i32
    %c0_i32_1 = arith.constant 0 : i32
    return %c0_i32, %c0_i32_0 : i32, i32
  }
  func.func @transform_5(%arg0: i32) -> (i32, i32) {
    %c0_i32 = arith.constant 0 : i32
    %c0_i32_0 = arith.constant 0 : i32
    %c0_i32_1 = arith.constant 0 : i32
    return %c0_i32, %c0_i32_0 : i32, i32
  }
  func.func @transform_6(%arg0: i32) -> (i32, i32) {
    %c0_i32 = arith.constant 0 : i32
    %c0_i32_0 = arith.constant 0 : i32
    %c0_i32_1 = arith.constant 0 : i32
    return %c0_i32, %c0_i32_0 : i32, i32
  }
  func.func @transform_7(%arg0: i32) -> (i32, i32) {
    %c0_i32 = arith.constant 0 : i32
    %c0_i32_0 = arith.constant 0 : i32
    %c0_i32_1 = arith.constant 0 : i32
    return %c0_i32, %c0_i32_0 : i32, i32
  }
  func.func @transform_8(%arg0: i32) -> (i32, i32) {
    %c0_i32 = arith.constant 0 : i32
    %c0_i32_0 = arith.constant 0 : i32
    %c0_i32_1 = arith.constant 0 : i32
    return %c0_i32, %c0_i32_0 : i32, i32
  }
  func.func @transform_9(%arg0: i32) -> (i32, i32) {
    %c0_i32 = arith.constant 0 : i32
    %c0_i32_0 = arith.constant 0 : i32
    %c0_i32_1 = arith.constant 0 : i32
    return %c0_i32, %c0_i32_0 : i32, i32
  }
  func.func @transform_10(%arg0: i32) -> (i32, i32) {
    %c0_i32 = arith.constant 0 : i32
    %c0_i32_0 = arith.constant 0 : i32
    %c0_i32_1 = arith.constant 0 : i32
    return %c0_i32, %c0_i32_0 : i32, i32
  }
  func.func @transform_11(%arg0: i32) -> (i32, i32) {
    %c0_i32 = arith.constant 0 : i32
    %c0_i32_0 = arith.constant 0 : i32
    return %arg0, %c0_i32 : i32, i32
  }
}

</mosaic_0001>

<bundles_post_ra>
// kernel: tpu_custom_call.1
= control target key start
LH: loop header
LB: loop body
LE: loop exit
PB: predicated region body
PF: predicated region fallthrough
CT: control target
= control target key end

     0   :  { %16 = vsyncpa [#allocation3], 0  ;;  %s3363_s0 = inlined_call_operand.vmem [shape: f32[16,561], index: 0, kind: input, shape index: {}]   ;;  %s3364_s1 = inlined_call_operand.hbm [shape: bf16[561,256], index: 1, kind: input, shape index: {}]   ;;  %s3365_s2 = inlined_call_operand.hbm [shape: bf16[561,256], index: 2, kind: input, shape index: {}]   ;;  %s3366_s3 = inlined_call_operand.hbm [shape: bf16[561,256], index: 3, kind: input, shape index: {}]   ;;  %s3367_s4 = inlined_call_operand.vmem [shape: f32[1,256], index: 4, kind: input, shape index: {}]   ;;  %s3368_s5 = inlined_call_operand.vmem [shape: f32[1,256], index: 5, kind: input, shape index: {}]   ;;  %s3369_s6 = inlined_call_operand.vmem [shape: f32[1,256], index: 6, kind: input, shape index: {}]   ;;  %s3370_s7 = inlined_call_operand.vmem [shape: bf16[256,64], index: 7, kind: input, shape index: {}]   ;;  %s3371_s8 = inlined_call_operand.vmem [shape: f32[1,64], index: 8, kind: input, shape index: {}]   ;;  %s3372_s9 = inlined_call_operand.vmem [shape: f32[1,64], index: 9, kind: input, shape index: {}]   ;;  %s3373_s10 = inlined_call_operand.vmem [shape: f32[1,64], index: 10, kind: input, shape index: {}]   ;;  %s3374_s11 = inlined_call_operand.hbm [shape: bf16[16,64], index: 11, kind: output, shape index: {}]  }
   0x1   :  { %17 = vsyncpa [#allocation6], 0 }
   0x2   :  { %18 = vsyncpa [#allocation4], 0  ;;  %s3000_s17 = smov [#allocation5]   ;;  %s3001_s19 = smov [#allocation2]  }
   0x3   :  { %s38_s18 = sshll.u32 %s3000_s17, 4  ;;  %s26_s20 = sshll.u32 %s3001_s19, 4  ;;  %s39_s18 = int_to_ptr.vmem [resolvable:$true] %s38_s18  ;;  %s27_s20 = int_to_ptr.vmem [resolvable:$true] %s26_s20 }
   0x4   :  { %s2922_s21 = scalar_lea.vmem %s39_s18, 9088  ;;  %p2927_p1 = scmp.lt.s32.totalorder %s39_s18, %s39_s18 }
   0x5   :  { %p2923_p0 = scmp.ne.s32.totalorder %s39_s18, %s2922_s21  ;;  %p2928_p2 = scmp.lt.s32.totalorder %s2922_s21, %s2922_s21 }
   0x7   :  { %p2929_p3 = por %p2928_p2, %p2927_p1 }
   0x9   :  { %p2930_p4 = pnand %p2929_p3, %p2923_p0 }
   0xb   :  { %2933 = shalt.err (!%p2930_p4)
}
   0xc   :  { %s3002_s22 = smov 128   ;;  %s3003_s23 = smov 8  }
   0xd   :  { %44 = dma.hbm_to_vmem [thread:$0]  %s3365_s2, 9088, %s39_s18, [#allocation6], %s3002_s22, %s3002_s22, %s3003_s23  }
   0xe   :  { %s2942_s26 = scalar_lea.vmem %s27_s20, 9088  ;;  %p2947_p6 = scmp.lt.s32.totalorder %s27_s20, %s27_s20 }
   0xf   :  { %p2943_p5 = scmp.ne.s32.totalorder %s27_s20, %s2942_s26  ;;  %p2948_p7 = scmp.lt.s32.totalorder %s2942_s26, %s2942_s26 }
  0x11   :  { %p2949_p8 = por %p2948_p7, %p2947_p6 }
  0x13   :  { %p2950_p9 = pnand %p2949_p8, %p2943_p5 }
  0x15   :  { %2953 = shalt.err (!%p2950_p9)
}
  0x16   :  { %32 = dma.hbm_to_vmem [thread:$0]  %s3364_s1, 9088, %s27_s20, [#allocation3], %s3002_s22, %s3002_s22, %s3003_s23  }
  0x17   :  { %s3004_s29 = smov [#allocation7]  }
  0x18   :  { %s50_s30 = sshll.u32 %s3004_s29, 4  ;;  %s51_s30 = int_to_ptr.vmem [resolvable:$true] %s50_s30 }
  0x19   :  { %s2962_s12 = scalar_lea.vmem %s51_s30, 9088  ;;  %p2967_p11 = scmp.lt.s32.totalorder %s51_s30, %s51_s30 }
  0x1a   :  { %p2963_p10 = scmp.ne.s32.totalorder %s51_s30, %s2962_s12  ;;  %p2968_p12 = scmp.lt.s32.totalorder %s2962_s12, %s2962_s12 }
  0x1c   :  { %p2969_p13 = por %p2968_p12, %p2967_p11 }
  0x1e   :  { %p2970_p0 = pnand %p2969_p13, %p2963_p10 }
  0x20   :  { %2973 = shalt.err (!%p2970_p0)
}
  0x21   :  { %56 = dma.hbm_to_vmem [thread:$0]  %s3366_s3, 9088, %s51_s30, [#allocation6], %s3002_s22, %s3002_s22, %s3003_s23  }
  0x22   :  { %2994 = dma.done.wait [#allocation3], 9088  }
  0x23   :  { %2995 = vsyncadd [#allocation3], 4294958208 }
  0x24   :  { %2996 = dma.done.wait [#allocation6], 18176  }
  0x25   :  { %2997 = vsyncadd [#allocation6], 4294949120  ;;  %v2509_v0 = vld [vmem:[#allocation5 + $0x74] ss:$8 sps:$4 sm:$0xff]   ;;  %v2513_v2 = vld [vmem:[#allocation5 + $0x70] ss:$8 sps:$4 sm:$0xff]  }
  0x26   :  { %v2511_v1 = vld [vmem:[#allocation5 + $0x174] ss:$8 sps:$4 sm:$0xff]   ;;  %706 = vmatprep.subr.bf16.mxu0 %v2509_v0  ;;  %v2514_v3 = vld [vmem:[#allocation5 + $0x170] ss:$8 sps:$4 sm:$0xff]   ;;  %v2515_v4 = vld [vmem:[#allocation5 + $0x64] ss:$8 sps:$4 sm:$0xff]  }
  0x27   :  { %749 = vmatprep.subr.bf16.mxu1 %v2511_v1  ;;  %707 = vmatpush1.bf16.msra.mxu0 %v2513_v2  ;;  %v2517_v5 = vld [vmem:[#allocation5 + $0x164] ss:$8 sps:$4 sm:$0xff]   ;;  %v2519_v6 = vld [vmem:[#allocation5 + $0x60] ss:$8 sps:$4 sm:$0xff]   ;;  %v2521_v8 = vld [vmem:[#allocation5 + $0x54] ss:$8 sps:$4 sm:$0xff]  }
  0x28   :  { %750 = vmatpush1.bf16.msra.mxu1 %v2514_v3  ;;  %708 = vmatprep.subr.bf16.mxu0 %v2515_v4  ;;  %v2520_v7 = vld [vmem:[#allocation5 + $0x160] ss:$8 sps:$4 sm:$0xff]   ;;  %v2523_v9 = vld [vmem:[#allocation5 + $0x154] ss:$8 sps:$4 sm:$0xff]   ;;  %v2525_v10 = vld [vmem:[#allocation5 + $0x50] ss:$8 sps:$4 sm:$0xff]  }
  0x29   :  { %751 = vmatprep.subr.bf16.mxu1 %v2517_v5  ;;  %v2526_v11 = vld [vmem:[#allocation5 + $0x150] ss:$8 sps:$4 sm:$0xff]   ;;  %v2527_v12 = vld [vmem:[#allocation5 + $0x44] ss:$8 sps:$4 sm:$0xff]   ;;  %v2531_v14 = vld [vmem:[#allocation5 + $0x40] ss:$8 sps:$4 sm:$0xff]  }
  0x2a   :  { %v2529_v13 = vld [vmem:[#allocation5 + $0x144] ss:$8 sps:$4 sm:$0xff]   ;;  %v2532_v15 = vld [vmem:[#allocation5 + $0x140] ss:$8 sps:$4 sm:$0xff]   ;;  %v2533_v16 = vld [vmem:[#allocation5 + $0x34] ss:$8 sps:$4 sm:$0xff]  }
  0x2b   :  { %709 = vmatpush1.bf16.msra.mxu0 %v2519_v6  ;;  %v2535_v17 = vld [vmem:[#allocation5 + $0x134] ss:$8 sps:$4 sm:$0xff]   ;;  %v2537_v18 = vld [vmem:[#allocation5 + $0x30] ss:$8 sps:$4 sm:$0xff]   ;;  %v2539_v20 = vld [vmem:[#allocation5 + $0x24] ss:$8 sps:$4 sm:$0xff]  }
  0x2c   :  { %752 = vmatpush1.bf16.msra.mxu1 %v2520_v7  ;;  %710 = vmatprep.subr.bf16.mxu0 %v2521_v8  ;;  %v2538_v19 = vld [vmem:[#allocation5 + $0x130] ss:$8 sps:$4 sm:$0xff]   ;;  %v2541_v21 = vld [vmem:[#allocation5 + $0x124] ss:$8 sps:$4 sm:$0xff]   ;;  %v2543_v22 = vld [vmem:[#allocation5 + $0x20] ss:$8 sps:$4 sm:$0xff]  }
  0x2d   :  { %753 = vmatprep.subr.bf16.mxu1 %v2523_v9  ;;  %v2544_v23 = vld [vmem:[#allocation5 + $0x120] ss:$8 sps:$4 sm:$0xff]   ;;  %v2545_v24 = vld [vmem:[#allocation5 + $0x14] ss:$8 sps:$4 sm:$0xff]   ;;  %v2549_v26 = vld [vmem:[#allocation5 + $0x10] ss:$8 sps:$4 sm:$0xff]  }
  0x2e   :  { %v2547_v25 = vld [vmem:[#allocation5 + $0x114] ss:$8 sps:$4 sm:$0xff]   ;;  %v2550_v27 = vld [vmem:[#allocation5 + $0x110] ss:$8 sps:$4 sm:$0xff]   ;;  %v2551_v28 = vld [vmem:[#allocation5 + $0x4] ss:$8 sps:$4 sm:$0xff]  }
  0x2f   :  { %711 = vmatpush1.bf16.msra.mxu0 %v2525_v10  ;;  %v2553_v29 = vld [vmem:[#allocation5 + $0x104] ss:$8 sps:$4 sm:$0xff]   ;;  %v2555_v30 = vld [vmem:[#allocation5] ss:$8 sps:$4 sm:$0xff]   ;;  %v2557_v32 = vld [vmem:[#allocation5 + $0xf4] ss:$8 sps:$4 sm:$0xff]  }
  0x30   :  { %754 = vmatpush1.bf16.msra.mxu1 %v2526_v11  ;;  %712 = vmatprep.subr.bf16.mxu0 %v2527_v12  ;;  %v2556_v31 = vld [vmem:[#allocation5 + $0x100] ss:$8 sps:$4 sm:$0xff]   ;;  %v2559_v33 = vld [vmem:[#allocation5 + $0x1f4] ss:$8 sps:$4 sm:$0xff]   ;;  %v2561_v34 = vld [vmem:[#allocation5 + $0xf0] ss:$8 sps:$4 sm:$0xff]  }
  0x31   :  { %755 = vmatprep.subr.bf16.mxu1 %v2529_v13  ;;  %v2562_v35 = vld [vmem:[#allocation5 + $0x1f0] ss:$8 sps:$4 sm:$0xff]   ;;  %v2563_v36 = vld [vmem:[#allocation5 + $0xe4] ss:$8 sps:$4 sm:$0xff]   ;;  %v2567_v38 = vld [vmem:[#allocation5 + $0xe0] ss:$8 sps:$4 sm:$0xff]  }
  0x32   :  { %v2565_v37 = vld [vmem:[#allocation5 + $0x1e4] ss:$8 sps:$4 sm:$0xff]   ;;  %v2568_v39 = vld [vmem:[#allocation5 + $0x1e0] ss:$8 sps:$4 sm:$0xff]   ;;  %v2569_v40 = vld [vmem:[#allocation5 + $0xd4] ss:$8 sps:$4 sm:$0xff]  }
  0x33   :  { %713 = vmatpush1.bf16.msra.mxu0 %v2531_v14  ;;  %v2571_v41 = vld [vmem:[#allocation5 + $0x1d4] ss:$8 sps:$4 sm:$0xff]   ;;  %v2573_v42 = vld [vmem:[#allocation5 + $0xd0] ss:$8 sps:$4 sm:$0xff]   ;;  %v2575_v44 = vld [vmem:[#allocation5 + $0xc4] ss:$8 sps:$4 sm:$0xff]  }
  0x34   :  { %756 = vmatpush1.bf16.msra.mxu1 %v2532_v15  ;;  %714 = vmatprep.subr.bf16.mxu0 %v2533_v16  ;;  %v2574_v43 = vld [vmem:[#allocation5 + $0x1d0] ss:$8 sps:$4 sm:$0xff]   ;;  %v2577_v45 = vld [vmem:[#allocation5 + $0x1c4] ss:$8 sps:$4 sm:$0xff]   ;;  %v2579_v46 = vld [vmem:[#allocation5 + $0xc0] ss:$8 sps:$4 sm:$0xff]  }
  0x35   :  { %757 = vmatprep.subr.bf16.mxu1 %v2535_v17  ;;  %v2580_v47 = vld [vmem:[#allocation5 + $0x1c0] ss:$8 sps:$4 sm:$0xff]   ;;  %v82_v48 = vld [vmem:[%s3363_s0 + $0x8] sm:$0xff]  ;;  %v87_v51 = vld [vmem:[%s3363_s0 + $0x30] sm:$0xff]  ;;  %vm697_vm0 = vcmask 1040384   ;;  %vm693_vm1 = vcmask 400384  }
  0x36   :  { %v2581_v49 = vld [vmem:[#allocation5 + $0xb4] ss:$8 sps:$4 sm:$0xff]   ;;  %v92_v52 = vmul.f32 0.2631579, %v82_v48  ;;  %v84_v53 = vld [vmem:[%s3363_s0 + $0x18] sm:$0xff]  ;;  %v89_v54 = vld [vmem:[%s3363_s0 + $0x40] sm:$0xff] }
  0x37   :  { %715 = vmatpush1.bf16.msra.mxu0 %v2537_v18  ;;  %v2583_v50 = vld [vmem:[#allocation5 + $0x1b4] ss:$8 sps:$4 sm:$0xff]   ;;  %v97_v55 = vmul.f32 0.2631579, %v87_v51  ;;  %v3090_v56 = vmul.f32 0.2631579, %v84_v53 }
  0x38   :  { %758 = vmatpush1.bf16.msra.mxu1 %v2538_v19  ;;  %716 = vmatprep.subr.bf16.mxu0 %v2539_v20  ;;  %v3092_v57 = vmul.f32 0.2631579, %v89_v54  ;;  %v102_v58 = vmul.f32 %v92_v52, %v92_v52  ;;  %v81_v59 = vld [vmem:[%s3363_s0] sm:$0xff]  ;;  %v86_v60 = vld [vmem:[%s3363_s0 + $0x28] sm:$0xff]  ;;  %v83_v61 = vld [vmem:[%s3363_s0 + $0x10] sm:$0xff]  ;;  %vm2161_vm2 = vcmask 523264  }
  0x39   :  { %759 = vmatprep.subr.bf16.mxu1 %v2541_v21  ;;  %v2585_v62 = vld [vmem:[#allocation5 + $0xb0] ss:$8 sps:$4 sm:$0xff]   ;;  %v107_v63 = vmul.f32 %v97_v55, %v97_v55  ;;  %v104_v0 = vmul.f32 %v3090_v56, %v3090_v56  ;;  %v3107_v2 = vmul.f32 0.2631579, %v81_v59  ;;  %v88_v3 = vld [vmem:[%s3363_s0 + $0x38] sm:$0xff]  ;;  %vm2215_vm3 = vcmask 519168  }
  0x3a   :  { %v109_v1 = vmul.f32 %v3092_v57, %v3092_v57  ;;  %v3112_v4 = vmul.f32 %v102_v58, %v92_v52  ;;  %v147_v5 = vadd.f32 1.0, %v102_v58  ;;  %v3114_v6 = vmul.f32 0.2631579, %v86_v60  ;;  %v2586_v8 = vld [vmem:[#allocation5 + $0x1b0] ss:$8 sps:$4 sm:$0xff]   ;;  %s3006_s24 = smov [#allocation8]  }
  0x3b   :  { %717 = vmatpush1.bf16.msra.mxu0 %v2543_v22  ;;  %v3116_v7 = vmul.f32 0.2631579, %v83_v61  ;;  %v2587_v9 = vld [vmem:[#allocation5 + $0xa4] ss:$8 sps:$4 sm:$0xff]   ;;  %v3118_v10 = vmul.f32 %v107_v63, %v97_v55  ;;  %v152_v11 = vadd.f32 1.0, %v107_v63  ;;  %v3121_v12 = vmul.f32 %v104_v0, %v3090_v56  ;;  %s2223_s25 = sshll.u32 %s3006_s24, 4  ;;  %s2224_s25 = int_to_ptr.vmem [resolvable:$true] %s2223_s25 }
  0x3c   :  { %760 = vmatpush1.bf16.msra.mxu1 %v2544_v23  ;;  %718 = vmatprep.subr.bf16.mxu0 %v2545_v24  ;;  %v3124_v13 = vmul.f32 %v109_v1, %v3092_v57  ;;  %v2589_v14 = vld [vmem:[#allocation5 + $0x1a4] ss:$8 sps:$4 sm:$0xff]   ;;  %2846 = vrcp.f32 %v147_v5  ;;  %v149_v15 = vadd.f32 1.0, %v104_v0  ;;  %v154_v16 = vadd.f32 1.0, %v109_v1  ;;  %v2591_v21 = vld [vmem:[#allocation5 + $0xa0] ss:$8 sps:$4 sm:$0xff]   ;;  %p2979_p2 = scmp.lt.s32.totalorder %s2224_s25, %s2224_s25 }
  0x3d   :  { %761 = vmatprep.subr.bf16.mxu1 %v2547_v25  ;;  %v3128_v17 = vmul.f32 %v3107_v2, %v3107_v2  ;;  %2848 = vrcp.f32 %v152_v11  ;;  %v3132_v18 = vmul.f32 %v3114_v6, %v3114_v6  ;;  %v3134_v19 = vmul.f32 0.2631579, %v88_v3  ;;  %v2592_v23 = vld [vmem:[#allocation5 + $0x1a0] ss:$8 sps:$4 sm:$0xff]   ;;  %v2593_v24 = vld [vmem:[#allocation5 + $0x94] ss:$8 sps:$4 sm:$0xff]  }
  0x3e   :  { %v3138_v20 = vmul.f32 %v3116_v7, %v3116_v7  ;;  %2850 = vrcp.f32 %v149_v15  ;;  %v123_v48 = vadd.f32 1.0, %v3116_v7  ;;  %v2609_v54 = vld [vmem:[#allocation2 + $0x74] ss:$8 sps:$4 sm:$0xff]  }
  0x3f   :  { %719 = vmatpush1.bf16.msra.mxu0 %v2549_v26  ;;  %v146_v22 = vadd.f32 1.0, %v3128_v17  ;;  %2852 = vrcp.f32 %v154_v16  ;;  %v151_v25 = vadd.f32 1.0, %v3132_v18  ;;  %v3144_v26 = vmul.f32 %v3134_v19, %v3134_v19  ;;  %v2612_v15 = vld [vmem:[#allocation5 + $0x224] ss:$8 sps:$4 sm:$0xff]  }
  0x40   :  { %762 = vmatpush1.bf16.msra.mxu1 %v2550_v27  ;;  %720 = vmatprep.subr.bf16.mxu0 %v2551_v28  ;;  %v148_v27 = vadd.f32 1.0, %v3138_v20  ;;  %v2595_v28 = vld [vmem:[#allocation5 + $0x194] ss:$8 sps:$4 sm:$0xff]   ;;  %v128_v58 = vadd.f32 1.0, %v3134_v19  ;;  %v111_v16 = vmul.f32 %v3128_v17, %v3107_v2 }
  0x41   :  { %763 = vmatprep.subr.bf16.mxu1 %v2553_v29  ;;  %2854 = vrcp.f32 %v146_v22  ;;  %v3005_v29 = vmov 0  }
  0x42   :  { %2856 = vrcp.f32 %v151_v25  ;;  %v113_v25 = vmul.f32 %v3138_v20, %v3116_v7  ;;  %v171_v7 = vadd.f32 1.0, %v111_v16 }
  0x43   :  { %721 = vmatpush1.bf16.msra.mxu0 %v2555_v30  ;;  %v3149_v30 = vsel %vm697_vm0, 65535, %v3005_v29  ;;  %2858 = vrcp.f32 %v148_v27  ;;  %v118_v27 = vmul.f32 %v3144_v26, %v3134_v19  ;;  %v2618_v19 = vld [vmem:[#allocation5 + $0x214] ss:$8 sps:$4 sm:$0xff]  }
  0x44   :  { %764 = vmatpush1.bf16.msra.mxu1 %v2556_v31  ;;  %722 = vmatprep.subr.bf16.mxu0 %v2557_v32  ;;  %v122_v31 = vadd.f32 1.0, %v92_v52  ;;  %v153_v32 = vadd.f32 1.0, %v3144_v26 }
  0x45   :  { %765 = vmatprep.subr.bf16.mxu1 %v2559_v33  ;;  %v337_v33 = vld [vmem:[#allocation5 + $0x230] sm:$0x11] }
  0x46   :  { %2860 = vrcp.f32 %v153_v32  ;;  %v2306_v60 = vcombine.low %v337_v33, %v337_v33  ;;  %v2615_v32 = vld [vmem:[#allocation2 + $0x64] ss:$8 sps:$4 sm:$0xff]  }
  0x47   :  { %723 = vmatpush2.bf16.msra.mxu0 %v2561_v34  ;;  %v127_v34 = vadd.f32 1.0, %v97_v55  ;;  %2862 = vrcp.f32 %v122_v31 }
  0x48   :  { %766 = vmatpush2.bf16.msra.mxu1 %v2562_v35  ;;  %724 = vmatprep.subr.bf16.mxu0 %v2563_v36  ;;  %v2597_v35 = vld [vmem:[#allocation5 + $0x90] ss:$8 sps:$4 sm:$0xff]  }
  0x49   :  { %767 = vmatprep.subr.bf16.mxu1 %v2565_v37  ;;  %v2598_v36 = vld [vmem:[#allocation5 + $0x190] ss:$8 sps:$4 sm:$0xff]   ;;  %v121_v37 = vadd.f32 1.0, %v3107_v2  ;;  %2864 = vrcp.f32 %v127_v34  ;;  %v2847_v55 = vpop.eup %2846  ;;  %v174_v2 = vadd.f32 1.0, %v3121_v12  ;;  %v173_v34 = vadd.f32 1.0, %v113_v25 }
  0x4a   :  { %v2849_v59 = vpop.eup %2848  ;;  %v2613_v12 = vld [vmem:[#allocation2 + $0x60] ss:$8 sps:$4 sm:$0xff]  }
  0x4b   :  { %725 = vmatpush2.bf16.msra.mxu0 %v2567_v38  ;;  %v2599_v38 = vld [vmem:[#allocation5 + $0x84] ss:$8 sps:$4 sm:$0xff]   ;;  %2866 = vrcp.f32 %v121_v37  ;;  %v167_v63 = vpack.c.bf16 %v2849_v59, %v2847_v55  ;;  %v178_v37 = vadd.f32 1.0, %v118_v27 }
  0x4c   :  { %768 = vmatpush2.bf16.msra.mxu1 %v2568_v39  ;;  %726 = vmatprep.subr.bf16.mxu0 %v2569_v40  ;;  %v2601_v39 = vld [vmem:[#allocation5 + $0x184] ss:$8 sps:$4 sm:$0xff]   ;;  %v126_v40 = vadd.f32 1.0, %v3114_v6 }
  0x4d   :  { %769 = vmatprep.subr.bf16.mxu1 %v2571_v41  ;;  %v2307_v41 = vcombine.high %v337_v33, %v337_v33  ;;  %738 = vmatprep.mubr.bf16.mxu0 %v167_v63  ;;  %v177_v33 = vadd.f32 1.0, %v3118_v10  ;;  %v2639_v63 = vld [vmem:[#allocation2 + $0x164] ss:$8 sps:$4 sm:$0xff]  }
  0x4e   :  { %2868 = vrcp.f32 %v126_v40 }
  0x4f   :  { %727 = vmatpush2.bf16.msra.mxu0 %v2573_v42  ;;  %v85_v42 = vld [vmem:[%s3363_s0 + $0x20] sm:$0xff]  ;;  %v704_v53 = vand.u32 %v2307_v41, %v3149_v30 }
  0x50   :  { %770 = vmatpush2.bf16.msra.mxu1 %v2574_v43  ;;  %728 = vmatprep.subr.bf16.mxu0 %v2575_v44  ;;  %v90_v43 = vld [vmem:[%s3363_s0 + $0x48] sm:$0xff]  ;;  %v124_v44 = vadd.f32 1.0, %v3090_v56  ;;  %v2624_v41 = vld [vmem:[#allocation5 + $0x204] ss:$8 sps:$4 sm:$0xff]  }
  0x51   :  { %771 = vmatprep.subr.bf16.mxu1 %v2577_v45  ;;  %v129_v45 = vadd.f32 1.0, %v3092_v57 }
  0x52   :  { %2870 = vrcp.f32 %v124_v44 }
  0x53   :  { %729 = vmatpush2.bf16.msra.mxu0 %v2579_v46  ;;  %v3162_v46 = vmul.f32 0.2631579, %v85_v42  ;;  %2872 = vrcp.f32 %v129_v45  ;;  %v2627_v45 = vld [vmem:[#allocation2 + $0x44] ss:$8 sps:$4 sm:$0xff]  }
  0x54   :  { %772 = vmatpush2.bf16.msra.mxu1 %v2580_v47  ;;  %730 = vmatprep.subr.bf16.mxu0 %v2581_v49  ;;  %v3164_v47 = vmul.f32 0.2631579, %v90_v43  ;;  %v2603_v49 = vld [vmem:[#allocation5 + $0x80] ss:$8 sps:$4 sm:$0xff]   ;;  %2874 = vrcp.f32 %v123_v48 }
  0x55   :  { %773 = vmatprep.subr.bf16.mxu1 %v2583_v50  ;;  %v2604_v50 = vld [vmem:[#allocation5 + $0x180] ss:$8 sps:$4 sm:$0xff]   ;;  %v3169_v51 = vmul.f32 %v3162_v46, %v3162_v46  ;;  %v125_v61 = vadd.f32 1.0, %v3162_v46 }
  0x56   :  { %v3173_v52 = vmul.f32 %v3164_v47, %v3164_v47  ;;  %v130_v0 = vadd.f32 1.0, %v3164_v47  ;;  %v2619_v43 = vld [vmem:[#allocation2 + $0x50] ss:$8 sps:$4 sm:$0xff]  }
  0x57   :  { %731 = vmatpush2.bf16.msra.mxu0 %v2585_v62  ;;  %v150_v56 = vadd.f32 1.0, %v3169_v51  ;;  %v2851_v62 = vpop.eup %2850 }
  0x58   :  { %774 = vmatpush2.bf16.msra.mxu1 %v2586_v8  ;;  %732 = vmatprep.subr.bf16.mxu0 %v2587_v9  ;;  %v155_v57 = vadd.f32 1.0, %v3173_v52  ;;  %v2853_v1 = vpop.eup %2852  ;;  %v701_v9 = vand.u32 %v2306_v60, %v3149_v30  ;;  %v2631_v60 = vld [vmem:[#allocation2 + $0x170] ss:$8 sps:$4 sm:$0xff]  }
  0x59   :  { %775 = vmatprep.subr.bf16.mxu1 %v2589_v14  ;;  %2876 = vrcp.f32 %v150_v56  ;;  %v2855_v3 = vpop.eup %2854  ;;  %v169_v5 = vpack.c.bf16 %v2853_v1, %v2851_v62  ;;  %v2625_v56 = vld [vmem:[#allocation2 + $0x40] ss:$8 sps:$4 sm:$0xff]   ;;  %v120_v1 = vmul.f32 %v3173_v52, %v3164_v47 }
  0x5a   :  { %2878 = vrcp.f32 %v155_v57  ;;  %v2857_v8 = vpop.eup %2856 }
  0x5b   :  { %733 = vmatpush2.bf16.msra.mxu0 %v2591_v21  ;;  %2880 = vrcp.f32 %v128_v58  ;;  %v2859_v11 = vpop.eup %2858  ;;  %781 = vmatprep.mubr.bf16.mxu1 %v169_v5  ;;  %v166_v14 = vpack.c.bf16 %v2857_v8, %v2855_v3  ;;  %v116_v21 = vmul.f32 %v3132_v18, %v3114_v6  ;;  %v2610_v6 = vld [vmem:[#allocation5 + $0x220] ss:$8 sps:$4 sm:$0xff]   ;;  %v2630_v58 = vld [vmem:[#allocation2 + $0x34] ss:$8 sps:$4 sm:$0xff]  }
  0x5c   :  { %776 = vmatpush2.bf16.msra.mxu1 %v2592_v23  ;;  %734 = vmatprep.subr.bf16.mxu0 %v2593_v24  ;;  %2882 = vrcp.f32 %v125_v61  ;;  %v2861_v22 = vpop.eup %2860  ;;  %v2607_v23 = vld [vmem:[#allocation2 + $0x70] ss:$8 sps:$4 sm:$0xff]   ;;  %v172_v24 = vadd.f32 1.0, %v3112_v4  ;;  %v179_v4 = vadd.f32 1.0, %v3124_v13 }
  0x5d   :  { %777 = vmatprep.subr.bf16.mxu1 %v2595_v28  ;;  %2884 = vrcp.f32 %v130_v0  ;;  %v2863_v28 = vpop.eup %2862  ;;  %v168_v31 = vpack.c.bf16 %v2861_v22, %v2859_v11  ;;  %v176_v26 = vadd.f32 1.0, %v116_v21  ;;  %v115_v0 = vmul.f32 %v3169_v51, %v3162_v46  ;;  %v2628_v5 = vld [vmem:[#allocation2 + $0x30] ss:$8 sps:$4 sm:$0xff]   ;;  %v2637_v46 = vld [vmem:[#allocation2 + $0x160] ss:$8 sps:$4 sm:$0xff]  }
  0x5e   :  { %v2865_v17 = vpop.eup %2864  ;;  %2886 = vrcp.f32 %v172_v24  ;;  %v2645_v51 = vld [vmem:[#allocation2 + $0x154] ss:$8 sps:$4 sm:$0xff]   ;;  %v2634_v22 = vld [vmem:[#allocation2 + $0x20] ss:$8 sps:$4 sm:$0xff]  }
  0x5f   :  { %735 = vmatpush2.bf16.msra.mxu0 %v2597_v35  ;;  %v3195_v18 = vpop.eup %2866  ;;  %v142_v20 = vpack.c.bf16 %v2865_v17, %v2863_v28  ;;  %2888 = vrcp.f32 %v177_v33  ;;  %v2642_v24 = vld [vmem:[#allocation2 + $0x14] ss:$8 sps:$4 sm:$0xff]   ;;  %v2643_v28 = vld [vmem:[#allocation2 + $0x150] ss:$8 sps:$4 sm:$0xff]   ;;  %v2649_v17 = vld [vmem:[#allocation2 + $0x140] ss:$8 sps:$4 sm:$0xff]  }
  0x60   :  { %778 = vmatpush2.bf16.msra.mxu1 %v2598_v36  ;;  %736 = vmatprep.subr.bf16.mxu0 %v2599_v38  ;;  %v3197_v10 = vpop.eup %2868  ;;  %2890 = vrcp.f32 %v174_v2  ;;  %v2621_v36 = vld [vmem:[#allocation2 + $0x54] ss:$8 sps:$4 sm:$0xff]   ;;  %v2640_v33 = vld [vmem:[#allocation2 + $0x10] ss:$8 sps:$4 sm:$0xff]   ;;  %v2648_v2 = vld [vmem:[#allocation2 + $0x4] ss:$8 sps:$4 sm:$0xff]  }
  0x61   :  { %779 = vmatprep.subr.bf16.mxu1 %v2601_v39  ;;  %v2871_v35 = vpop.eup %2870  ;;  %v141_v13 = vpack.c.bf16 %v3197_v10, %v3195_v18  ;;  %2892 = vrcp.f32 %v179_v4  ;;  %v2616_v39 = vld [vmem:[#allocation5 + $0x210] ss:$8 sps:$4 sm:$0xff]   ;;  %v2725_v10 = vld [vmem:[#allocation7 + $0x74] ss:$8 sps:$4 sm:$0xff]  }
  0x62   :  { %v2873_v38 = vpop.eup %2872  ;;  %2894 = vrcp.f32 %v171_v7  ;;  %v2646_v4 = vld [vmem:[#allocation2] ss:$8 sps:$4 sm:$0xff]   ;;  %v2654_v7 = vld [vmem:[#allocation2 + $0xf4] ss:$8 sps:$4 sm:$0xff]  }
  0x63   :  { %737 = vmatpush2.bf16.msra.mxu0 %v2603_v49  ;;  %v3201_v40 = vpop.eup %2874  ;;  %2896 = vrcp.f32 %v176_v26  ;;  %v2622_v49 = vld [vmem:[#allocation5 + $0x200] ss:$8 sps:$4 sm:$0xff]   ;;  %v144_v61 = vpack.c.bf16 %v2873_v38, %v2871_v35  ;;  %v2660_v35 = vld [vmem:[#allocation2 + $0xe4] ss:$8 sps:$4 sm:$0xff]   ;;  %v2669_v38 = vld [vmem:[#allocation2 + $0x114] ss:$8 sps:$4 sm:$0xff]  }
  0x64   :  { %780 = vmatpush2.bf16.msra.mxu1 %v2604_v50  ;;  %800 = vmatprep.subr.bf16.mxu0 %v704_v53  ;;  %2898 = vrcp.f32 %v173_v34  ;;  %v2633_v53 = vld [vmem:[#allocation2 + $0x174] ss:$8 sps:$4 sm:$0xff]   ;;  %v2720_v18 = vld [vmem:[#allocation2 + $0x200] ss:$8 sps:$4 sm:$0xff]  }
  0x65   :  { %1199 = vmatprep.subr.bf16.mxu1 %v2609_v54  ;;  %2900 = vrcp.f32 %v178_v37 }
  0x66   :  { %739 = vmatmul.mubr.bf16.vlgmr.msra.gmra.mxu0 %v166_v14  ;;  %v2877_v42 = vpop.eup %2876  ;;  %v175_v14 = vadd.f32 1.0, %v115_v0  ;;  %v2685_v0 = vld [vmem:[#allocation2 + $0x1e0] ss:$8 sps:$4 sm:$0xff]  }
  0x67   :  { %801 = vmatpush1.bf16.msra.mxu0 %v701_v9  ;;  %824 = vmatprep.mubr.bf16.mxu0 %v3005_v29  ;;  %v2879_v44 = vpop.eup %2878  ;;  %v2636_v9 = vld [vmem:[#allocation2 + $0x24] ss:$8 sps:$4 sm:$0xff]  }
  0x68   :  { %782 = vmatmul.mubr.bf16.vlgmr.msra.gmra.mxu1 %v168_v31  ;;  %802 = vmatprep.subr.bf16.mxu0 %v2612_v15  ;;  %v3203_v48 = vpop.eup %2880  ;;  %v170_v57 = vpack.c.bf16 %v2879_v44, %v2877_v42  ;;  %v180_v15 = vadd.f32 1.0, %v120_v1  ;;  %2902 = vrcp.f32 %v175_v14  ;;  %v2651_v31 = vld [vmem:[#allocation2 + $0x144] ss:$8 sps:$4 sm:$0xff]   ;;  %v2667_v42 = vld [vmem:[#allocation2 + $0x110] ss:$8 sps:$4 sm:$0xff]  }
  0x69   :  { %1200 = vmatpush1.bf16.msra.mxu1 %v2607_v23  ;;  %1231 = vmatprep.mubr.bf16.mxu1 %v142_v20  ;;  %v3205_v50 = vpop.eup %2882  ;;  %v143_v54 = vpack.c.bf16 %v3203_v48, %v3201_v40  ;;  %v2663_v20 = vld [vmem:[#allocation2 + $0x124] ss:$8 sps:$4 sm:$0xff]   ;;  %v2664_v44 = vld [vmem:[#allocation2 + $0xd0] ss:$8 sps:$4 sm:$0xff]   ;;  %v2693_v1 = vld [vmem:[#allocation2 + $0x1d4] ss:$8 sps:$4 sm:$0xff]  }
  0x6a   :  { %1201 = vmatprep.subr.bf16.mxu1 %v2615_v32  ;;  %v3209_v55 = vpop.eup %2884  ;;  %2904 = vrcp.f32 %v180_v15  ;;  %v2691_v14 = vld [vmem:[#allocation2 + $0x1d0] ss:$8 sps:$4 sm:$0xff]   ;;  %v2743_v40 = vld [vmem:[#allocation7 + $0x44] ss:$8 sps:$4 sm:$0xff]   ;;  %v2738_v48 = vld [vmem:[#allocation7 + $0x150] ss:$8 sps:$4 sm:$0xff]  }
  0x6b   :  { %803 = vmatpush1.bf16.msra.mxu0 %v2610_v6  ;;  %v145_v59 = vpack.c.bf16 %v3209_v55, %v3205_v50  ;;  %v3213_v62 = vpop.eup %2886  ;;  %v2657_v6 = vld [vmem:[#allocation2 + $0x134] ss:$8 sps:$4 sm:$0xff]   ;;  %v2741_v50 = vld [vmem:[#allocation7 + $0x40] ss:$8 sps:$4 sm:$0xff]   ;;  %v2749_v55 = vld [vmem:[#allocation7 + $0x34] ss:$8 sps:$4 sm:$0xff]  }
  0x6c   :  { %804 = vmatprep.subr.bf16.mxu0 %v2618_v19  ;;  %v3219_v3 = vpop.eup %2888  ;;  %v2655_v19 = vld [vmem:[#allocation2 + $0x130] ss:$8 sps:$4 sm:$0xff]  }
  0x6d   :  { %1202 = vmatpush1.bf16.msra.mxu1 %v2613_v12  ;;  %v3221_v8 = vpop.eup %2890  ;;  %v192_v11 = vpack.c.bf16 %v3219_v3, %v3213_v62  ;;  %v2652_v12 = vld [vmem:[#allocation2 + $0xf0] ss:$8 sps:$4 sm:$0xff]   ;;  %v2752_v62 = vld [vmem:[#allocation7 + $0x134] ss:$8 sps:$4 sm:$0xff]   ;;  %v2747_v3 = vld [vmem:[#allocation7 + $0x30] ss:$8 sps:$4 sm:$0xff]  }
  0x6e   :  { %1203 = vmatprep.subr.bf16.mxu1 %v2621_v36  ;;  %v3226_v16 = vpop.eup %2892  ;;  %v2661_v36 = vld [vmem:[#allocation2 + $0x120] ss:$8 sps:$4 sm:$0xff]   ;;  %v266_v15 = vld [vmem:[#allocation2 + $0x230] sm:$0x11] }
  0x6f   :  { %805 = vmatpush1.bf16.msra.mxu0 %v2616_v39  ;;  %v3228_v47 = vpop.eup %2894  ;;  %v194_v52 = vpack.c.bf16 %v3226_v16, %v3221_v8  ;;  %v2658_v39 = vld [vmem:[#allocation2 + $0xe0] ss:$8 sps:$4 sm:$0xff]   ;;  %v2755_v8 = vld [vmem:[#allocation7 + $0x24] ss:$8 sps:$4 sm:$0xff]  }
  0x70   :  { %806 = vmatprep.subr.bf16.mxu0 %v2624_v41  ;;  %v3232_v21 = vpop.eup %2896  ;;  %v2666_v41 = vld [vmem:[#allocation2 + $0xd4] ss:$8 sps:$4 sm:$0xff]  }
  0x71   :  { %1204 = vmatpush1.bf16.msra.mxu1 %v2619_v43  ;;  %v3234_v23 = vpop.eup %2898  ;;  %v191_v25 = vpack.c.bf16 %v3232_v21, %v3228_v47  ;;  %v2675_v43 = vld [vmem:[#allocation2 + $0x104] ss:$8 sps:$4 sm:$0xff]   ;;  %v2758_v16 = vld [vmem:[#allocation7 + $0x124] ss:$8 sps:$4 sm:$0xff]  }
  0x72   :  { %1205 = vmatprep.subr.bf16.mxu1 %v2627_v45  ;;  %v3238_v27 = vpop.eup %2900  ;;  %v2672_v45 = vld [vmem:[#allocation2 + $0xc4] ss:$8 sps:$4 sm:$0xff]  }
  0x73   :  { %807 = vmatpush1.bf16.msra.mxu0 %v2622_v49  ;;  %v193_v32 = vpack.c.bf16 %v3238_v27, %v3234_v23  ;;  %v2673_v49 = vld [vmem:[#allocation2 + $0x100] ss:$8 sps:$4 sm:$0xff]  }
  0x74   :  { %1242 = vmatprep.subr.bf16.mxu0 %v2633_v53  ;;  %v2681_v53 = vld [vmem:[#allocation2 + $0x1f4] ss:$8 sps:$4 sm:$0xff]  }
  0x75   :  { %1206 = vmatpush1.bf16.msra.mxu1 %v2625_v56  ;;  %v3242_v26 = vpop.eup %2902  ;;  %v2670_v56 = vld [vmem:[#allocation2 + $0xc0] ss:$8 sps:$4 sm:$0xff]  }
  0x76   :  { %2308 = vmatmul.mubr.msk.bf16.vlgmr.msra.gmra.mxu0 %vm693_vm1, %v170_v57  ;;  %1207 = vmatprep.subr.bf16.mxu1 %v2630_v58  ;;  %v2678_v57 = vld [vmem:[#allocation2 + $0xb4] ss:$8 sps:$4 sm:$0xff]   ;;  %v2679_v58 = vld [vmem:[#allocation2 + $0x1f0] ss:$8 sps:$4 sm:$0xff]  }
  0x77   :  { %1243 = vmatpush1.bf16.msra.mxu0 %v2631_v60  ;;  %1274 = vmatprep.mubr.bf16.mxu0 %v144_v61  ;;  %v3244_v34 = vpop.eup %2904  ;;  %v2687_v60 = vld [vmem:[#allocation2 + $0x1e4] ss:$8 sps:$4 sm:$0xff]   ;;  %v2676_v61 = vld [vmem:[#allocation2 + $0xb0] ss:$8 sps:$4 sm:$0xff]  }
  0x78   :  { %1244 = vmatprep.subr.bf16.mxu0 %v2639_v63  ;;  %v195_v37 = vpack.c.bf16 %v3244_v34, %v3242_v26  ;;  %v2684_v63 = vld [vmem:[#allocation2 + $0xa4] ss:$8 sps:$4 sm:$0xff]  }
  0x79   :  { %1208 = vmatpush1.bf16.msra.mxu1 %v2628_v5  ;;  %v2682_v5 = vld [vmem:[#allocation2 + $0xa0] ss:$8 sps:$4 sm:$0xff]  }
  0x7a   :  { %1209 = vmatprep.subr.bf16.mxu1 %v2636_v9  ;;  %v2690_v9 = vld [vmem:[#allocation2 + $0x94] ss:$8 sps:$4 sm:$0xff]  }
  0x7b   :  { %1245 = vmatpush1.bf16.msra.mxu0 %v2637_v46  ;;  %v2699_v46 = vld [vmem:[#allocation2 + $0x1c4] ss:$8 sps:$4 sm:$0xff]  }
  0x7c   :  { %1246 = vmatprep.subr.bf16.mxu0 %v2645_v51  ;;  %v2688_v51 = vld [vmem:[#allocation2 + $0x90] ss:$8 sps:$4 sm:$0xff]  }
  0x7d   :  { %1210 = vmatpush1.bf16.msra.mxu1 %v2634_v22  ;;  %v2696_v22 = vld [vmem:[#allocation2 + $0x84] ss:$8 sps:$4 sm:$0xff]  }
  0x7e   :  { %1211 = vmatprep.subr.bf16.mxu1 %v2642_v24  ;;  %v2380_v24 = vcombine.high %v266_v15, %v266_v15 }
  0x7f   :  { %1247 = vmatpush1.bf16.msra.mxu0 %v2643_v28  ;;  %v2697_v28 = vld [vmem:[#allocation2 + $0x1c0] ss:$8 sps:$4 sm:$0xff]  }
  0x80   :  { %1248 = vmatprep.subr.bf16.mxu0 %v2651_v31  ;;  %v2702_v31 = vld [vmem:[#allocation2 + $0x1b4] ss:$8 sps:$4 sm:$0xff]  }
  0x81   :  { %1212 = vmatpush1.bf16.msra.mxu1 %v2640_v33  ;;  %v2694_v33 = vld [vmem:[#allocation2 + $0x80] ss:$8 sps:$4 sm:$0xff]  }
  0x82   :  { %1213 = vmatprep.subr.bf16.mxu1 %v2648_v2  ;;  %v2379_v2 = vcombine.low %v266_v15, %v266_v15  ;;  %v2770_v15 = vld [vmem:[#allocation7 + $0x104] ss:$8 sps:$4 sm:$0xff]  }
  0x83   :  { %1249 = vmatpush1.bf16.msra.mxu0 %v2649_v17  ;;  %v1197_v17 = vand.u32 %v2380_v24, %v3149_v30  ;;  %v2776_v24 = vld [vmem:[#allocation7 + $0x1f4] ss:$8 sps:$4 sm:$0xff]  }
  0x84   :  { %1250 = vmatprep.subr.bf16.mxu0 %v2657_v6  ;;  %v2700_v6 = vld [vmem:[#allocation2 + $0x1b0] ss:$8 sps:$4 sm:$0xff]  }
  0x85   :  { %1214 = vmatpush1.bf16.msra.mxu1 %v2646_v4  ;;  %v2707_v4 = vld [vmem:[#allocation2 + $0x1a4] ss:$8 sps:$4 sm:$0xff]  }
  0x86   :  { %1215 = vmatprep.subr.bf16.mxu1 %v2654_v7  ;;  %v1194_v7 = vand.u32 %v2379_v2, %v3149_v30  ;;  %v2782_v2 = vld [vmem:[#allocation7 + $0x1e4] ss:$8 sps:$4 sm:$0xff]  }
  0x87   :  { %1251 = vmatpush1.bf16.msra.mxu0 %v2655_v19  ;;  %v2710_v19 = vld [vmem:[#allocation2 + $0x224] ss:$8 sps:$4 sm:$0xff]  }
  0x88   :  { %1252 = vmatprep.subr.bf16.mxu0 %v2663_v20  ;;  %v2705_v20 = vld [vmem:[#allocation2 + $0x1a0] ss:$8 sps:$4 sm:$0xff]  }
  0x89   :  { %1216 = vmatpush2.bf16.msra.mxu1 %v2652_v12  ;;  %v2713_v12 = vld [vmem:[#allocation2 + $0x194] ss:$8 sps:$4 sm:$0xff]  }
  0x8a   :  { %1217 = vmatprep.subr.bf16.mxu1 %v2660_v35  ;;  %v2708_v35 = vld [vmem:[#allocation2 + $0x220] ss:$8 sps:$4 sm:$0xff]  }
  0x8b   :  { %1253 = vmatpush1.bf16.msra.mxu0 %v2661_v36  ;;  %v2716_v36 = vld [vmem:[#allocation2 + $0x214] ss:$8 sps:$4 sm:$0xff]  }
  0x8c   :  { %1254 = vmatprep.subr.bf16.mxu0 %v2669_v38  ;;  %v2711_v38 = vld [vmem:[#allocation2 + $0x190] ss:$8 sps:$4 sm:$0xff]  }
  0x8d   :  { %1218 = vmatpush2.bf16.msra.mxu1 %v2658_v39  ;;  %v2719_v39 = vld [vmem:[#allocation2 + $0x184] ss:$8 sps:$4 sm:$0xff]  }
  0x8e   :  { %1219 = vmatprep.subr.bf16.mxu1 %v2666_v41  ;;  %v2714_v41 = vld [vmem:[#allocation2 + $0x210] ss:$8 sps:$4 sm:$0xff]  }
  0x8f   :  { %1255 = vmatpush1.bf16.msra.mxu0 %v2667_v42  ;;  %v2722_v42 = vld [vmem:[#allocation2 + $0x204] ss:$8 sps:$4 sm:$0xff]  }
  0x90   :  { %1256 = vmatprep.subr.bf16.mxu0 %v2675_v43  ;;  %v2717_v43 = vld [vmem:[#allocation2 + $0x180] ss:$8 sps:$4 sm:$0xff]  }
  0x91   :  { %1220 = vmatpush2.bf16.msra.mxu1 %v2664_v44  ;;  %v2728_v44 = vld [vmem:[#allocation7 + $0x174] ss:$8 sps:$4 sm:$0xff]  }
  0x92   :  { %1221 = vmatprep.subr.bf16.mxu1 %v2672_v45  ;;  %v2731_v45 = vld [vmem:[#allocation7 + $0x64] ss:$8 sps:$4 sm:$0xff]  }
  0x93   :  { %1257 = vmatpush1.bf16.msra.mxu0 %v2673_v49  ;;  %v2726_v49 = vld [vmem:[#allocation7 + $0x170] ss:$8 sps:$4 sm:$0xff]  }
  0x94   :  { %1258 = vmatprep.subr.bf16.mxu0 %v2681_v53  ;;  %v2734_v53 = vld [vmem:[#allocation7 + $0x164] ss:$8 sps:$4 sm:$0xff]  }
  0x95   :  { %1222 = vmatpush2.bf16.msra.mxu1 %v2670_v56  ;;  %v2729_v56 = vld [vmem:[#allocation7 + $0x60] ss:$8 sps:$4 sm:$0xff]  }
  0x96   :  { %1223 = vmatprep.subr.bf16.mxu1 %v2678_v57  ;;  %v2737_v57 = vld [vmem:[#allocation7 + $0x54] ss:$8 sps:$4 sm:$0xff]  }
  0x97   :  { %1259 = vmatpush2.bf16.msra.mxu0 %v2679_v58  ;;  %v2732_v58 = vld [vmem:[#allocation7 + $0x160] ss:$8 sps:$4 sm:$0xff]  }
  0x98   :  { %1260 = vmatprep.subr.bf16.mxu0 %v2687_v60  ;;  %v2740_v60 = vld [vmem:[#allocation7 + $0x154] ss:$8 sps:$4 sm:$0xff]  }
  0x99   :  { %1224 = vmatpush2.bf16.msra.mxu1 %v2676_v61  ;;  %v2735_v61 = vld [vmem:[#allocation7 + $0x50] ss:$8 sps:$4 sm:$0xff]  }
  0x9a   :  { %1225 = vmatprep.subr.bf16.mxu1 %v2684_v63  ;;  %v2761_v63 = vld [vmem:[#allocation7 + $0x14] ss:$8 sps:$4 sm:$0xff]  }
  0x9b   :  { %1261 = vmatpush2.bf16.msra.mxu0 %v2685_v0  ;;  %v2756_v0 = vld [vmem:[#allocation7 + $0x120] ss:$8 sps:$4 sm:$0xff]  }
  0x9c   :  { %1262 = vmatprep.subr.bf16.mxu0 %v2693_v1  ;;  %v2764_v1 = vld [vmem:[#allocation7 + $0x114] ss:$8 sps:$4 sm:$0xff]  }
  0x9d   :  { %1226 = vmatpush2.bf16.msra.mxu1 %v2682_v5  ;;  %v2759_v5 = vld [vmem:[#allocation7 + $0x10] ss:$8 sps:$4 sm:$0xff]  }
  0x9e   :  { %1227 = vmatprep.subr.bf16.mxu1 %v2690_v9  ;;  %v2767_v9 = vld [vmem:[#allocation7 + $0x4] ss:$8 sps:$4 sm:$0xff]  }
  0x9f   :  { %1263 = vmatpush2.bf16.msra.mxu0 %v2691_v14  ;;  %v2762_v14 = vld [vmem:[#allocation7 + $0x110] ss:$8 sps:$4 sm:$0xff]  }
  0xa0   :  { %1264 = vmatprep.subr.bf16.mxu0 %v2699_v46  ;;  %v2765_v46 = vld [vmem:[#allocation7] ss:$8 sps:$4 sm:$0xff]  }
  0xa1   :  { %1228 = vmatpush2.bf16.msra.mxu1 %v2688_v51  ;;  %v2773_v51 = vld [vmem:[#allocation7 + $0xf4] ss:$8 sps:$4 sm:$0xff]  }
  0xa2   :  { %1229 = vmatprep.subr.bf16.mxu1 %v2696_v22  ;;  %v2768_v22 = vld [vmem:[#allocation7 + $0x100] ss:$8 sps:$4 sm:$0xff]  }
  0xa3   :  { %1265 = vmatpush2.bf16.msra.mxu0 %v2697_v28  ;;  %v2771_v28 = vld [vmem:[#allocation7 + $0xf0] ss:$8 sps:$4 sm:$0xff]  }
  0xa4   :  { %1266 = vmatprep.subr.bf16.mxu0 %v2702_v31  ;;  %v2779_v31 = vld [vmem:[#allocation7 + $0xe4] ss:$8 sps:$4 sm:$0xff]  }
  0xa5   :  { %1230 = vmatpush2.bf16.msra.mxu1 %v2694_v33  ;;  %v2774_v33 = vld [vmem:[#allocation7 + $0x1f0] ss:$8 sps:$4 sm:$0xff]  }
  0xa6   :  { %1293 = vmatprep.subr.bf16.mxu1 %v1197_v17  ;;  %v2777_v17 = vld [vmem:[#allocation7 + $0xe0] ss:$8 sps:$4 sm:$0xff]  }
  0xa7   :  { %1267 = vmatpush2.bf16.msra.mxu0 %v2700_v6  ;;  %v2785_v6 = vld [vmem:[#allocation7 + $0xd4] ss:$8 sps:$4 sm:$0xff]  }
  0xa8   :  { %1232 = vmatmul.mubr.bf16.vlgmr.msra.gmra.mxu1 %v141_v13  ;;  %1268 = vmatprep.subr.bf16.mxu0 %v2707_v4  ;;  %v2723_v13 = vld [vmem:[#allocation7 + $0x70] ss:$8 sps:$4 sm:$0xff]   ;;  %v2780_v4 = vld [vmem:[#allocation7 + $0x1e0] ss:$8 sps:$4 sm:$0xff]  }
  0xa9   :  { %1294 = vmatpush1.bf16.msra.mxu1 %v1194_v7  ;;  %1317 = vmatprep.mubr.bf16.mxu1 %v3005_v29  ;;  %v2788_v7 = vld [vmem:[#allocation7 + $0x1d4] ss:$8 sps:$4 sm:$0xff]  }
  0xaa   :  { %1295 = vmatprep.subr.bf16.mxu1 %v2710_v19  ;;  %v2783_v19 = vld [vmem:[#allocation7 + $0xd0] ss:$8 sps:$4 sm:$0xff]  }
  0xab   :  { %1269 = vmatpush2.bf16.msra.mxu0 %v2705_v20  ;;  %v2791_v20 = vld [vmem:[#allocation7 + $0xc4] ss:$8 sps:$4 sm:$0xff]  }
  0xac   :  { %1270 = vmatprep.subr.bf16.mxu0 %v2713_v12  ;;  %v2786_v12 = vld [vmem:[#allocation7 + $0x1d0] ss:$8 sps:$4 sm:$0xff]  }
  0xad   :  { %1296 = vmatpush1.bf16.msra.mxu1 %v2708_v35  ;;  %v2794_v35 = vld [vmem:[#allocation7 + $0x1c4] ss:$8 sps:$4 sm:$0xff]  }
  0xae   :  { %1297 = vmatprep.subr.bf16.mxu1 %v2716_v36  ;;  %v2789_v36 = vld [vmem:[#allocation7 + $0xc0] ss:$8 sps:$4 sm:$0xff]  }
  0xaf   :  { %1271 = vmatpush2.bf16.msra.mxu0 %v2711_v38  ;;  %v2797_v38 = vld [vmem:[#allocation7 + $0xb4] ss:$8 sps:$4 sm:$0xff]  }
  0xb0   :  { %1272 = vmatprep.subr.bf16.mxu0 %v2719_v39  ;;  %v2792_v39 = vld [vmem:[#allocation7 + $0x1c0] ss:$8 sps:$4 sm:$0xff]  }
  0xb1   :  { %1298 = vmatpush1.bf16.msra.mxu1 %v2714_v41  ;;  %v2800_v41 = vld [vmem:[#allocation7 + $0x1b4] ss:$8 sps:$4 sm:$0xff]  }
  0xb2   :  { %1299 = vmatprep.subr.bf16.mxu1 %v2722_v42  ;;  %v2795_v42 = vld [vmem:[#allocation7 + $0xb0] ss:$8 sps:$4 sm:$0xff]  }
  0xb3   :  { %1273 = vmatpush2.bf16.msra.mxu0 %v2717_v43  ;;  %v2803_v43 = vld [vmem:[#allocation7 + $0xa4] ss:$8 sps:$4 sm:$0xff]  }
  0xb4   :  { %1763 = vmatprep.subr.bf16.mxu0 %v2725_v10  ;;  %v2806_v10 = vld [vmem:[#allocation7 + $0x1a4] ss:$8 sps:$4 sm:$0xff]  }
  0xb5   :  { %1300 = vmatpush1.bf16.msra.mxu1 %v2720_v18  ;;  %v2798_v18 = vld [vmem:[#allocation7 + $0x1b0] ss:$8 sps:$4 sm:$0xff]  }
  0xb6   :  { %1275 = vmatmul.mubr.bf16.vlgmr.msra.gmra.mxu0 %v143_v54  ;;  %1806 = vmatprep.subr.bf16.mxu1 %v2728_v44  ;;  %v2746_v54 = vld [vmem:[#allocation7 + $0x144] ss:$8 sps:$4 sm:$0xff]   ;;  %v2809_v44 = vld [vmem:[#allocation7 + $0x94] ss:$8 sps:$4 sm:$0xff]  }
  0xb7   :  { %1764 = vmatpush1.bf16.msra.mxu0 %v2723_v13  ;;  %1795 = vmatprep.mubr.bf16.mxu0 %v192_v11  ;;  %v2750_v11 = vld [vmem:[#allocation7 + $0x130] ss:$8 sps:$4 sm:$0xff]   ;;  %v2801_v13 = vld [vmem:[#allocation7 + $0xa0] ss:$8 sps:$4 sm:$0xff]  }
  0xb8   :  { %2381 = vmatmul.mubr.msk.bf16.vlgmr.msra.gmra.mxu1 %vm693_vm1, %v145_v59  ;;  %1765 = vmatprep.subr.bf16.mxu0 %v2731_v45  ;;  %v2744_v59 = vld [vmem:[#allocation7 + $0x140] ss:$8 sps:$4 sm:$0xff]  }
  0xb9   :  { %1807 = vmatpush1.bf16.msra.mxu1 %v2726_v49  ;;  %1838 = vmatprep.mubr.bf16.mxu1 %v194_v52  ;;  %v2753_v52 = vld [vmem:[#allocation7 + $0x20] ss:$8 sps:$4 sm:$0xff]   ;;  %v1398_v49 = vld [vmem:[#allocation7 + $0x230] sm:$0x11] }
  0xba   :  { %1808 = vmatprep.subr.bf16.mxu1 %v2734_v53  ;;  %v2804_v45 = vld [vmem:[#allocation7 + $0x1a0] ss:$8 sps:$4 sm:$0xff]   ;;  %v2812_v53 = vld [vmem:[#allocation7 + $0x194] ss:$8 sps:$4 sm:$0xff]  }
  0xbb   :  { %1766 = vmatpush1.bf16.msra.mxu0 %v2729_v56  ;;  %v2807_v56 = vld [vmem:[#allocation7 + $0x90] ss:$8 sps:$4 sm:$0xff]  }
  0xbc   :  { %1767 = vmatprep.subr.bf16.mxu0 %v2737_v57  ;;  %v2815_v57 = vld [vmem:[#allocation7 + $0x84] ss:$8 sps:$4 sm:$0xff]  }
  0xbd   :  { %1809 = vmatpush1.bf16.msra.mxu1 %v2732_v58  ;;  %v2453_v58 = vcombine.high %v1398_v49, %v1398_v49 }
  0xbe   :  { %1810 = vmatprep.subr.bf16.mxu1 %v2740_v60  ;;  %v2810_v60 = vld [vmem:[#allocation7 + $0x190] ss:$8 sps:$4 sm:$0xff]  }
  0xbf   :  { %1768 = vmatpush1.bf16.msra.mxu0 %v2735_v61  ;;  %v2818_v61 = vld [vmem:[#allocation7 + $0x184] ss:$8 sps:$4 sm:$0xff]  }
  0xc0   :  { %1769 = vmatprep.subr.bf16.mxu0 %v2743_v40  ;;  %v2813_v40 = vld [vmem:[#allocation7 + $0x80] ss:$8 sps:$4 sm:$0xff]  }
  0xc1   :  { %1811 = vmatpush1.bf16.msra.mxu1 %v2738_v48  ;;  %v2452_v48 = vcombine.low %v1398_v49, %v1398_v49 }
  0xc2   :  { %1812 = vmatprep.subr.bf16.mxu1 %v2746_v54  ;;  %v1761_v54 = vand.u32 %v2453_v58, %v3149_v30 }
  0xc3   :  { %1770 = vmatpush1.bf16.msra.mxu0 %v2741_v50  ;;  %v2816_v50 = vld [vmem:[#allocation7 + $0x180] ss:$8 sps:$4 sm:$0xff]  }
  0xc4   :  { %1771 = vmatprep.subr.bf16.mxu0 %v2749_v55  ;;  %v1758_v55 = vand.u32 %v2452_v48, %v3149_v30  ;;  %v2829_v30 = vld [vmem:[#allocation7 + $0x204] ss:$8 sps:$4 sm:$0xff]  }
  0xc5   :  { %1813 = vmatpush1.bf16.msra.mxu1 %v2744_v59  ;;  %v2823_v59 = vld [vmem:[#allocation7 + $0x224] ss:$8 sps:$4 sm:$0xff]  }
  0xc6   :  { %1814 = vmatprep.subr.bf16.mxu1 %v2752_v62  ;;  %v2821_v62 = vld [vmem:[#allocation7 + $0x220] ss:$8 sps:$4 sm:$0xff]  }
  0xc7   :  { %1772 = vmatpush1.bf16.msra.mxu0 %v2747_v3  ;;  %v2826_v3 = vld [vmem:[#allocation7 + $0x214] ss:$8 sps:$4 sm:$0xff]  }
  0xc8   :  { %1773 = vmatprep.subr.bf16.mxu0 %v2755_v8  ;;  %v2824_v8 = vld [vmem:[#allocation7 + $0x210] ss:$8 sps:$4 sm:$0xff]  }
  0xc9   :  { %1815 = vmatpush1.bf16.msra.mxu1 %v2750_v11  ;;  %v2827_v11 = vld [vmem:[#allocation7 + $0x200] ss:$8 sps:$4 sm:$0xff]  }
  0xca   :  { %1816 = vmatprep.subr.bf16.mxu1 %v2758_v16 }
  0xcb   :  { %1774 = vmatpush1.bf16.msra.mxu0 %v2753_v52 }
  0xcc   :  { %1775 = vmatprep.subr.bf16.mxu0 %v2761_v63 }
  0xcd   :  { %1817 = vmatpush1.bf16.msra.mxu1 %v2756_v0 }
  0xce   :  { %1818 = vmatprep.subr.bf16.mxu1 %v2764_v1 }
  0xcf   :  { %1776 = vmatpush1.bf16.msra.mxu0 %v2759_v5 }
  0xd0   :  { %1777 = vmatprep.subr.bf16.mxu0 %v2767_v9 }
  0xd1   :  { %1819 = vmatpush1.bf16.msra.mxu1 %v2762_v14 }
  0xd2   :  { %1820 = vmatprep.subr.bf16.mxu1 %v2770_v15 }
  0xd3   :  { %1778 = vmatpush1.bf16.msra.mxu0 %v2765_v46 }
  0xd4   :  { %1779 = vmatprep.subr.bf16.mxu0 %v2773_v51 }
  0xd5   :  { %1821 = vmatpush1.bf16.msra.mxu1 %v2768_v22 }
  0xd6   :  { %1822 = vmatprep.subr.bf16.mxu1 %v2776_v24 }
  0xd7   :  { %1780 = vmatpush2.bf16.msra.mxu0 %v2771_v28 }
  0xd8   :  { %1781 = vmatprep.subr.bf16.mxu0 %v2779_v31 }
  0xd9   :  { %1823 = vmatpush2.bf16.msra.mxu1 %v2774_v33 }
  0xda   :  { %1824 = vmatprep.subr.bf16.mxu1 %v2782_v2 }
  0xdb   :  { %1782 = vmatpush2.bf16.msra.mxu0 %v2777_v17  ;;  %v1898_v17 = vlaneseq }
  0xdc   :  { %1783 = vmatprep.subr.bf16.mxu0 %v2785_v6 }
  0xdd   :  { %1825 = vmatpush2.bf16.msra.mxu1 %v2780_v4 }
  0xde   :  { %1826 = vmatprep.subr.bf16.mxu1 %v2788_v7 }
  0xdf   :  { %1784 = vmatpush2.bf16.msra.mxu0 %v2783_v19 }
  0xe0   :  { %1785 = vmatprep.subr.bf16.mxu0 %v2791_v20 }
  0xe1   :  { %1827 = vmatpush2.bf16.msra.mxu1 %v2786_v12  ;;  %v1899_v12 = vshrl.u32 %v1898_v17, 7 }
  0xe2   :  { %1828 = vmatprep.subr.bf16.mxu1 %v2794_v35 }
  0xe3   :  { %1786 = vmatpush2.bf16.msra.mxu0 %v2789_v36 }
  0xe4   :  { %1787 = vmatprep.subr.bf16.mxu0 %v2797_v38 }
  0xe5   :  { %1829 = vmatpush2.bf16.msra.mxu1 %v2792_v39 }
  0xe6   :  { %1830 = vmatprep.subr.bf16.mxu1 %v2800_v41 }
  0xe7   :  { %1788 = vmatpush2.bf16.msra.mxu0 %v2795_v42 }
  0xe8   :  { %1789 = vmatprep.subr.bf16.mxu0 %v2803_v43 }
  0xe9   :  { %1831 = vmatpush2.bf16.msra.mxu1 %v2798_v18 }
  0xea   :  { %1832 = vmatprep.subr.bf16.mxu1 %v2806_v10 }
  0xeb   :  { %1790 = vmatpush2.bf16.msra.mxu0 %v2801_v13 }
  0xec   :  { %1791 = vmatprep.subr.bf16.mxu0 %v2809_v44  ;;  %v3280_v44 = vsub.s32 0, %v1899_v12 }
  0xed   :  { %1833 = vmatpush2.bf16.msra.mxu1 %v2804_v45  ;;  %v3282_v45 = vsub.s32 1, %v1899_v12  ;;  %v2832_v12 = vld [vmem:[%s3370_s7 + $0x70] sm:$0xff]  }
  0xee   :  { %1834 = vmatprep.subr.bf16.mxu1 %v2812_v53 }
  0xef   :  { %1792 = vmatpush2.bf16.msra.mxu0 %v2807_v56 }
  0xf0   :  { %1793 = vmatprep.subr.bf16.mxu0 %v2815_v57  ;;  %v1896_v57 = vld [vmem:[%s3367_s4] sm:$0x3] }
  0xf1   :  { %1835 = vmatpush2.bf16.msra.mxu1 %v2810_v60 }
  0xf2   :  { %1836 = vmatprep.subr.bf16.mxu1 %v2818_v61 }
  0xf3   :  { %1794 = vmatpush2.bf16.msra.mxu0 %v2813_v40 }
  0xf4   :  { %1857 = vmatprep.subr.bf16.mxu0 %v1761_v54 }
  0xf5   :  { %1837 = vmatpush2.bf16.msra.mxu1 %v2816_v50 }
  0xf6   :  { %1796 = vmatmul.mubr.bf16.vlgmr.msra.gmra.mxu0 %v191_v25 }
  0xf7   :  { %1858 = vmatpush1.bf16.msra.mxu0 %v1758_v55  ;;  %1881 = vmatprep.mubr.bf16.mxu0 %v3005_v29 }
  0xf8   :  { %1839 = vmatmul.mubr.bf16.vlgmr.msra.gmra.mxu1 %v193_v32  ;;  %1859 = vmatprep.subr.bf16.mxu0 %v2823_v59 }
  0xfb   :  { %1860 = vmatpush1.bf16.msra.mxu0 %v2821_v62  ;;  %v1901_v62 = vrot.slane %v1896_v57, %v3280_v44 }
  0xfc   :  { %1861 = vmatprep.subr.bf16.mxu0 %v2826_v3  ;;  %v1905_v3 = vrot.slane %v1896_v57, %v3282_v45 }
  0xff   :  { %1862 = vmatpush1.bf16.msra.mxu0 %v2824_v8 }
 0x100   :  { %1863 = vmatprep.subr.bf16.mxu0 %v2829_v30 }
 0x103   :  { %1864 = vmatpush1.bf16.msra.mxu0 %v2827_v11 }
 0x106   :  { %2454 = vmatmul.mubr.msk.bf16.vlgmr.msra.gmra.mxu0 %vm693_vm1, %v195_v37 }
 0x126   :  { %v740_v29 = vpop.f32.mrf.mxu0 }
 0x128   :  { %v783_v47 = vpop.f32.mrf.mxu1  ;;  %v742_v21 = vpop.f32.mrf.mxu0 }
 0x129   :  { %v784_v6 = vadd.f32 %v783_v47, %v740_v29 }
 0x12a   :  { %v785_v23 = vpop.f32.mrf.mxu1  ;;  %v744_v25 = vpop.f32.mrf.mxu0 }
 0x12b   :  { %v786_v4 = vadd.f32 %v785_v23, %v742_v21 }
 0x12c   :  { %v787_v27 = vpop.f32.mrf.mxu1  ;;  %v746_v32 = vpop.f32.mrf.mxu0 }
 0x12d   :  { %v788_v35 = vadd.f32 %v787_v27, %v744_v25 }
 0x12e   :  { %v789_v52 = vpop.f32.mrf.mxu1 }
 0x12f   :  { %v790_v39 = vadd.f32 %v789_v52, %v746_v32 }
 0x136   :  { %v826_v16 = vpop.f32.mrf.mxu0 }
 0x137   :  { %v827_v7 = vadd.f32 %v826_v16, %v784_v6 }
 0x138   :  { %v828_v63 = vpop.f32.mrf.mxu0 }
 0x139   :  { %v829_v36 = vadd.f32 %v828_v63, %v786_v4 }
 0x13a   :  { %v830_v1 = vpop.f32.mrf.mxu0 }
 0x13b   :  { %v831_v41 = vadd.f32 %v830_v1, %v788_v35  ;;  %v2833_v35 = vld [vmem:[%s3370_s7 + $0x30] sm:$0xff]  }
 0x13c   :  { %v832_v9 = vpop.f32.mrf.mxu0 }
 0x13d   :  { %v833_v18 = vadd.f32 %v832_v9, %v790_v39  ;;  %v2836_v39 = vld [vmem:[%s3370_s7 + $0x60] sm:$0xff]  }
 0x168   :  { %v1233_v0 = vpop.f32.mrf.mxu1 }
 0x169   :  { %v1234_v38 = vadd.f32 %v1233_v0, %v827_v7 }
 0x16a   :  { %v1235_v5 = vpop.f32.mrf.mxu1 }
 0x16b   :  { %v1236_v42 = vadd.f32 %v1235_v5, %v829_v36  ;;  %v2834_v36 = vld [vmem:[%s3370_s7 + $0x68] sm:$0xff]  }
 0x16c   :  { %v1237_v14 = vpop.f32.mrf.mxu1 }
 0x16d   :  { %v1238_v49 = vadd.f32 %v1237_v14, %v831_v41  ;;  %v2837_v41 = vld [vmem:[%s3370_s7 + $0x20] sm:$0xff]  }
 0x16e   :  { %v1239_v46 = vpop.f32.mrf.mxu1 }
 0x16f   :  { %v1240_v58 = vadd.f32 %v1239_v46, %v833_v18  ;;  %v2840_v18 = vld [vmem:[%s3370_s7 + $0x50] sm:$0xff]  }
 0x176   :  { %v1276_v15 = vpop.f32.mrf.mxu0 }
 0x177   :  { %v1277_v43 = vadd.f32 %v1276_v15, %v1234_v38  ;;  %v2835_v38 = vld [vmem:[%s3370_s7 + $0x28] sm:$0xff]  }
 0x178   :  { %v1278_v26 = vpop.f32.mrf.mxu0  ;;  %v1319_v34 = vpop.f32.mrf.mxu1 }
 0x179   :  { %v1279_v53 = vadd.f32 %v1278_v26, %v1236_v42  ;;  %v1320_v61 = vadd.f32 %v1319_v34, %v1277_v43  ;;  %v2838_v42 = vld [vmem:[%s3370_s7 + $0x58] sm:$0xff]  }
 0x17a   :  { %v1280_v37 = vpop.f32.mrf.mxu0  ;;  %v1321_v51 = vpop.f32.mrf.mxu1  ;;  %v2839_v43 = vld [vmem:[%s3370_s7 + $0x18] sm:$0xff]  }
 0x17b   :  { %v1281_v40 = vadd.f32 %v1280_v37, %v1238_v49  ;;  %v1322_v8 = vadd.f32 %v1321_v51, %v1279_v53  ;;  %v2843_v49 = vld [vmem:[%s3370_s7 + $0x8] sm:$0xff]   ;;  %v2844_v53 = vld [vmem:[%s3370_s7 + $0x40] sm:$0xff]  }
 0x17c   :  { %v1282_v22 = vpop.f32.mrf.mxu0  ;;  %v1323_v24 = vpop.f32.mrf.mxu1 }
 0x17d   :  { %v1283_v50 = vadd.f32 %v1282_v22, %v1240_v58  ;;  %v1324_v21 = vadd.f32 %v1323_v24, %v1281_v40 }
 0x17e   :  { %v1325_v31 = vpop.f32.mrf.mxu1 }
 0x17f   :  { %v1326_v32 = vadd.f32 %v1325_v31, %v1283_v50 }
 0x1b6   :  { %v1797_v28 = vpop.f32.mrf.mxu0 }
 0x1b8   :  { %v1840_v33 = vpop.f32.mrf.mxu1  ;;  %v1799_v2 = vpop.f32.mrf.mxu0 }
 0x1b9   :  { %v1841_v56 = vadd.f32 %v1840_v33, %v1797_v28 }
 0x1ba   :  { %v1842_v19 = vpop.f32.mrf.mxu1  ;;  %v1801_v20 = vpop.f32.mrf.mxu0 }
 0x1bb   :  { %v1843_v48 = vadd.f32 %v1842_v19, %v1799_v2  ;;  %v2830_v19 = vld [vmem:[%s3370_s7 + $0x78] sm:$0xff]  }
 0x1bc   :  { %v1844_v10 = vpop.f32.mrf.mxu1  ;;  %v1803_v13 = vpop.f32.mrf.mxu0  ;;  %2478 = vmatprep.subr.bf16.mxu1 %v2830_v19 }
 0x1bd   :  { %v1845_v30 = vadd.f32 %v1844_v10, %v1801_v20  ;;  %v2831_v20 = vld [vmem:[%s3370_s7 + $0x38] sm:$0xff]   ;;  %v2841_v10 = vld [vmem:[%s3370_s7 + $0x10] sm:$0xff]  }
 0x1be   :  { %v1846_v55 = vpop.f32.mrf.mxu1  ;;  %2479 = vmatpush3.bf16.msra.mxu1 %v2831_v20 }
 0x1bf   :  { %v1847_v23 = vadd.f32 %v1846_v55, %v1803_v13  ;;  %2480 = vmatprep.subr.bf16.mxu1 %v2832_v12  ;;  %v2842_v13 = vld [vmem:[%s3370_s7 + $0x48] sm:$0xff]  }
 0x1c2   :  { %2481 = vmatpush3.bf16.msra.mxu1 %v2833_v35 }
 0x1c3   :  { %2482 = vmatprep.subr.bf16.mxu1 %v2834_v36 }
 0x1c6   :  { %v1883_v60 = vpop.f32.mrf.mxu0  ;;  %2483 = vmatpush3.bf16.msra.mxu1 %v2835_v38 }
 0x1c7   :  { %v1884_v54 = vadd.f32 %v1883_v60, %v1841_v56  ;;  %2484 = vmatprep.subr.bf16.mxu1 %v2836_v39  ;;  %v2845_v56 = vld [vmem:[%s3370_s7] sm:$0xff]  }
 0x1c8   :  { %v1885_v59 = vpop.f32.mrf.mxu0 }
 0x1c9   :  { %v1892_v11 = vadd.f32 %v1884_v54, %v1320_v61  ;;  %v1886_v29 = vadd.f32 %v1885_v59, %v1843_v48  ;;  %v1912_v54 = vld [vmem:[%s3368_s5] sm:$0x3] }
 0x1ca   :  { %v1887_v47 = vpop.f32.mrf.mxu0  ;;  %2485 = vmatpush3.bf16.msra.mxu1 %v2837_v41  ;;  %v1951_v50 = vrot.slane %v1912_v54, %v3280_v44  ;;  %v1955_v55 = vrot.slane %v1912_v54, %v3282_v45 }
 0x1cb   :  { %v1893_v25 = vadd.f32 %v1886_v29, %v1322_v8  ;;  %v1888_v27 = vadd.f32 %v1887_v47, %v1845_v30  ;;  %v1908_v0 = vadd.f32 %v1901_v62, %v1892_v11  ;;  %2486 = vmatprep.subr.bf16.mxu1 %v2838_v42 }
 0x1cc   :  { %v1889_v16 = vpop.f32.mrf.mxu0 }
 0x1cd   :  { %v1894_v52 = vadd.f32 %v1888_v27, %v1324_v21  ;;  %v1890_v63 = vadd.f32 %v1889_v16, %v1847_v23  ;;  %v1909_v1 = vadd.f32 %v1905_v3, %v1893_v25 }
 0x1ce   :  { %2487 = vmatpush3.bf16.msra.mxu1 %v2839_v43 }
 0x1cf   :  { %v1895_v5 = vadd.f32 %v1890_v63, %v1326_v32  ;;  %v1914_v9 = vadd.f32 %v1909_v1, %v1908_v0  ;;  %v1910_v14 = vadd.f32 %v1901_v62, %v1894_v52  ;;  %2488 = vmatprep.subr.bf16.mxu1 %v2840_v18  ;;  %v1913_v62 = vld [vmem:[%s3369_s6] sm:$0x3] }
 0x1d0   :  { %v1966_v11 = vrot.slane %v1913_v62, %v3280_v44  ;;  %v1970_v29 = vrot.slane %v1913_v62, %v3282_v45 }
 0x1d1   :  { %1915 = vadd.xlane.f32.xlu0 %v1914_v9  ;;  %v1911_v15 = vadd.f32 %v1905_v3, %v1895_v5 }
 0x1d2   :  { %2489 = vmatpush3.bf16.msra.mxu1 %v2841_v10 }
 0x1d3   :  { %v1917_v46 = vadd.f32 %v1911_v15, %v1910_v14  ;;  %2490 = vmatprep.subr.bf16.mxu1 %v2842_v13  ;;  %v2472_v13 = vld [vmem:[%s3372_s9] ss:$0 sm:$0xff]  ;;  %s2974_s9 = scalar_lea.vmem %s2224_s25, 128 }
 0x1d4   :  { %p2975_p1 = scmp.ne.s32.totalorder %s2224_s25, %s2974_s9  ;;  %p2980_p3 = scmp.lt.s32.totalorder %s2974_s9, %s2974_s9 }
 0x1d5   :  { %1918 = vadd.xlane.f32.xlu0 %v1917_v46 }
 0x1d6   :  { %2491 = vmatpush3.bf16.msra.mxu1 %v2843_v49  ;;  %p2981_p4 = por %p2980_p3, %p2979_p2 }
 0x1d7   :  { %2492 = vmatprep.subr.bf16.mxu1 %v2844_v53  ;;  %v2473_v53 = vld [vmem:[%s3373_s10] ss:$0 sm:$0xff] }
 0x1d8   :  { %p2982_p5 = pnand %p2981_p4, %p2975_p1 }
 0x1da   :  { %2493 = vmatpush3.bf16.msra.mxu1 %v2845_v56 }
 0x25a   :  { %v1916_v26 = vpop.xlane.xlu0 %1915 }
 0x25b   :  { %v1921_v34 = vmul.f32 0.00390625, %v1916_v26  ;;  %v2455_v26 = vld [vmem:[%s3371_s8] ss:$0 sm:$0xff] }
 0x25d   :  { %v1923_v37 = vsub.f32 %v1908_v0, %v1921_v34  ;;  %v1924_v51 = vsub.f32 %v1909_v1, %v1921_v34 }
 0x25e   :  { %v1919_v22 = vpop.xlane.xlu0 %1918 }
 0x25f   :  { %v1922_v24 = vmul.f32 0.00390625, %v1919_v22  ;;  %v1927_v28 = vmul.f32 %v1923_v37, %v1923_v37  ;;  %v1928_v31 = vmul.f32 %v1924_v51, %v1924_v51 }
 0x261   :  { %v1925_v33 = vsub.f32 %v1910_v14, %v1922_v24  ;;  %v1926_v2 = vsub.f32 %v1911_v15, %v1922_v24  ;;  %v1931_v17 = vadd.f32 %v1928_v31, %v1927_v28 }
 0x263   :  { %1932 = vadd.xlane.f32.xlu1 %v1931_v17  ;;  %v1929_v6 = vmul.f32 %v1925_v33, %v1925_v33  ;;  %v1930_v4 = vmul.f32 %v1926_v2, %v1926_v2 }
 0x265   :  { %v1934_v7 = vadd.f32 %v1930_v4, %v1929_v6 }
 0x267   :  { %1935 = vadd.xlane.f32.xlu1 %v1934_v7 }
 0x2ec   :  { %v1933_v57 = vpop.xlane.xlu1 %1932 }
 0x2ed   :  { %v1937_v58 = vmul.f32 0.00390625, %v1933_v57 }
 0x2ef   :  { %v1939_v60 = vadd.f32 1e-05, %v1937_v58 }
 0x2f0   :  { %v1936_v61 = vpop.xlane.xlu1 %1935 }
 0x2f1   :  { %2906 = vrsqrt.f32 %v1939_v60  ;;  %v1938_v40 = vmul.f32 0.00390625, %v1936_v61 }
 0x2f3   :  { %v1940_v48 = vadd.f32 1e-05, %v1938_v40 }
 0x2f5   :  { %2908 = vrsqrt.f32 %v1940_v48 }
 0x2fe   :  { %v2907_v59 = vpop.eup %2906 }
 0x2ff   :  { %v1944_v3 = vmul.f32 %v2907_v59, %v1924_v51  ;;  %v1943_v8 = vmul.f32 %v2907_v59, %v1923_v37 }
 0x301   :  { %v1959_v30 = vmul.f32 %v1955_v55, %v1944_v3  ;;  %v1958_v47 = vmul.f32 %v1951_v50, %v1943_v8 }
 0x302   :  { %v2909_v21 = vpop.eup %2908 }
 0x303   :  { %v1946_v23 = vmul.f32 %v2909_v21, %v1926_v2  ;;  %v1945_v25 = vmul.f32 %v2909_v21, %v1925_v33  ;;  %v1974_v32 = vadd.f32 %v1970_v29, %v1959_v30  ;;  %v1973_v52 = vadd.f32 %v1966_v11, %v1958_v47 }
 0x305   :  { %v1961_v27 = vmul.f32 %v1955_v55, %v1946_v23  ;;  %v1960_v16 = vmul.f32 %v1951_v50, %v1945_v25  ;;  %v1978_v1 = vmax.f32 %v1974_v32, 0.0  ;;  %v1977_v9 = vmax.f32 %v1973_v52, 0.0 }
 0x307   :  { %v1976_v63 = vadd.f32 %v1970_v29, %v1961_v27  ;;  %v1975_v0 = vadd.f32 %v1966_v11, %v1960_v16 }
 0x309   :  { %v1980_v5 = vmax.f32 %v1976_v63, 0.0  ;;  %v1979_v14 = vmax.f32 %v1975_v0, 0.0 }
 0x30b   :  { %v1982_v15 = vpack.c.bf16 %v1980_v5, %v1978_v1  ;;  %v1981_v46 = vpack.c.bf16 %v1979_v14, %v1977_v9 }
 0x30d   :  { %2150 = vmatprep.mubr.bf16.mxu1 %v1982_v15 }
 0x30e   :  { %2151 = vmatmul.mubr.bf16.vlgmr.msra.gmra.mxu1 %v1981_v46 }
 0x3ce   :  { %v2494_v44 = vpop.f32.mrf.mxu1 }
 0x3d0   :  { %v2495_v45 = vpop.f32.mrf.mxu1 }
 0x3d1   :  { %v2496_v34 = vadd.f32 %v2495_v45, %v2494_v44 }
 0x3d2   :  { %v2497_v37 = vpop.f32.mrf.mxu1 }
 0x3d3   :  { %v2153_v51 = vadd.f32 %v2496_v34, %v2455_v26 }
 0x3d4   :  { %v2498_v22 = vpop.f32.mrf.mxu1 }
 0x3d5   :  { %v2499_v24 = vadd.f32 %v2498_v22, %v2497_v37  ;;  %v2162_v28 = vsel %vm2161_vm2, %v2153_v51, 0.0 }
 0x3d6   :  { %2163 = vadd.xlane.f32.xlu0 %v2162_v28 }
 0x3d7   :  { %v2156_v31 = vadd.f32 %v2499_v24, %v2455_v26 }
 0x3d9   :  { %v2165_v33 = vsel %vm2161_vm2, %v2156_v31, 0.0 }
 0x3da   :  { %2166 = vadd.xlane.f32.xlu1 %v2165_v33 }
 0x45f   :  { %v2164_v2 = vpop.xlane.xlu0 %2163 }
 0x460   :  { %v2169_v17 = vmul.f32 0.015625, %v2164_v2 }
 0x462   :  { %v2171_v6 = vsub.f32 %v2153_v51, %v2169_v17 }
 0x463   :  { %v2167_v4 = vpop.xlane.xlu1 %2166 }
 0x464   :  { %v2170_v7 = vmul.f32 0.015625, %v2167_v4  ;;  %v2173_v19 = vmul.f32 %v2171_v6, %v2171_v6 }
 0x466   :  { %v2172_v20 = vsub.f32 %v2156_v31, %v2170_v7  ;;  %v2175_v12 = vsel %vm2161_vm2, %v2173_v19, 0.0 }
 0x467   :  { %2176 = vadd.xlane.f32.xlu0 %v2175_v12 }
 0x468   :  { %v2174_v35 = vmul.f32 %v2172_v20, %v2172_v20 }
 0x46a   :  { %v2178_v36 = vsel %vm2161_vm2, %v2174_v35, 0.0 }
 0x46b   :  { %2179 = vadd.xlane.f32.xlu1 %v2178_v36 }
 0x4f0   :  { %v2177_v38 = vpop.xlane.xlu0 %2176 }
 0x4f1   :  { %v2181_v39 = vmul.f32 0.015625, %v2177_v38 }
 0x4f3   :  { %v2183_v41 = vadd.f32 1e-05, %v2181_v39 }
 0x4f4   :  { %v2180_v42 = vpop.xlane.xlu1 %2179 }
 0x4f5   :  { %2910 = vrsqrt.f32 %v2183_v41  ;;  %v2182_v43 = vmul.f32 0.015625, %v2180_v42 }
 0x4f7   :  { %v2184_v18 = vadd.f32 1e-05, %v2182_v43 }
 0x4f9   :  { %2912 = vrsqrt.f32 %v2184_v18 }
 0x502   :  { %v2911_v10 = vpop.eup %2910 }
 0x503   :  { %v2187_v49 = vmul.f32 %v2911_v10, %v2171_v6 }
 0x505   :  { %v2195_v56 = vmul.f32 %v2472_v13, %v2187_v49 }
 0x506   :  { %v2913_v57 = vpop.eup %2912 }
 0x507   :  { %v2188_v58 = vmul.f32 %v2913_v57, %v2172_v20  ;;  %v2203_v60 = vadd.f32 %v2473_v53, %v2195_v56 }
 0x509   :  { %v2196_v61 = vmul.f32 %v2472_v13, %v2188_v58  ;;  %v2205_v40 = vmax.f32 %v2203_v60, 0.0 }
 0x50b   :  { %v2204_v48 = vadd.f32 %v2473_v53, %v2196_v61  ;;  %v2476_v54 = vpack.c.bf16 %v2205_v40, %v2205_v40 }
 0x50d   :  { %v2206_v50 = vmax.f32 %v2204_v48, 0.0  ;;  %2216 = vst.msk [vmem:[#allocation8] sm:$0xf] %vm2215_vm3, %v2476_v54 }
 0x50f   :  { %v2477_v55 = vpack.c.bf16 %v2206_v50, %v2206_v50 }
 0x511   :  { %2217 = vst.msk [vmem:[#allocation8 + $0x4] sm:$0xf] %vm2215_vm3, %v2477_v55 }
 0x512   :  { %2985 = shalt.err (!%p2982_p5)
}
 0x513   :  { %s3007_s10 = smov 64   ;;  %s3008_s26 = smov 4  }
 0x514   :  { %2229 = dma.vmem_to_hbm [thread:$0]  %s2224_s25, 128, %s3374_s11, [#allocation4], %s3007_s10, %s3007_s10, %s3008_s26  }
 0x515   :  { %2998 = dma.done.wait [#allocation4], 128  }
 0x516   :  { %2999 = vsyncadd [#allocation4], 4294967168 }
 0x517   :  { %2233 = vsyncpa [#allocation3], 1 }
 0x518   :  { %2234 = vsyncpa [#allocation6], 1 }
 0x519   :  { %2235 = vsyncpa [#allocation4], 1 }

</bundles_post_ra>
